<compile_context>
chip_gen: v5e
topology: v5e:2x2
jax: 0.10.0
libtpu: 0.0.40
codegen_flags: <defaults>
</compile_context>

<pallas_src>
import functools
import math

import jax
import jax.numpy as jnp
from jax.experimental import pallas as pl
from jax.experimental.pallas import tpu as pltpu

# MXU operand / HBM weight dtype: bf16 in, f32 accumulate (fast path on all
# generations).  Set to jnp.float32 for bit-exact f32 matmuls.
MXU_DTYPE = jnp.bfloat16

_LANE = 128
_NEG_INF = -1e30


def _round_up(x, m):
    return ((x + m - 1) // m) * m


# ---------------------------------------------------------------------------
# Fused ViT kernel: one grid step = (one batch element, one encoder layer)
# ---------------------------------------------------------------------------
def _vit_kernel(patches_ref, add_ref, patch_w_ref,
                ln1_g_ref, ln1_b_ref, wqkv_ref, bqkv_ref, wo_ref, bo_ref,
                ln2_g_ref, ln2_b_ref, w1_ref, b1_ref, w2_ref, b2_ref,
                fn_g_ref, fn_b_ref, out_w_ref, out_b_ref,
                o_ref, x_scr,
                *, n_heads, seq_len, eps, scale):
    l = pl.program_id(1)
    n_layers = pl.num_programs(1)

    # --- prologue (first layer step): patch embedding + cls + pos emb -------
    # patches rows: [0]=zeros (cls slot), [1..T]=im2col patches, rest zero-pad.
    # add rows:     [0]=cls_emb+pos[0],   [1..T]=patch_bias+pos[r], rest zero.
    @pl.when(l == 0)
    def _():
        emb = jnp.dot(patches_ref[0].astype(MXU_DTYPE), patch_w_ref[...],
                      preferred_element_type=jnp.float32)
        x_scr[...] = emb + add_ref[...]
        # TODO(synk): dropout after pos-emb is identity (inference semantics).

    x = x_scr[...]                                   # (S_pad, E) f32 residual

    def layernorm(v, g, b):
        mean = jnp.mean(v, axis=-1, keepdims=True)
        c = v - mean
        var = jnp.mean(c * c, axis=-1, keepdims=True)
        return (c * jax.lax.rsqrt(var + eps)) * g + b

    # --- attention block (pre-norm) ------------------------------------------
    xn = layernorm(x, ln1_g_ref[0], ln1_b_ref[0])
    qkv = jnp.dot(xn.astype(MXU_DTYPE), wqkv_ref[0],
                  preferred_element_type=jnp.float32) + bqkv_ref[0]
    s_pad, e3 = qkv.shape
    e = e3 // 3
    d = e // n_heads

    # mask padded key columns (sequence was padded S -> S_pad)
    key_idx = jax.lax.broadcasted_iota(jnp.int32, (1, s_pad), 1)
    key_mask = jnp.where(key_idx < seq_len,
                         jnp.float32(0.0), jnp.float32(_NEG_INF))

    wo = wo_ref[0]                                   # (E, E) bf16
    attn_proj = jnp.zeros((s_pad, e), jnp.float32)
    # Per-head loop is unrolled (small head count); each head's output is
    # folded directly into the out-projection -> no concat / extra HBM trip.
    for h in range(n_heads):
        q = (qkv[:, h * d:(h + 1) * d] * scale).astype(MXU_DTYPE)
        k = qkv[:, e + h * d:e + (h + 1) * d].astype(MXU_DTYPE)
        v = qkv[:, 2 * e + h * d:2 * e + (h + 1) * d].astype(MXU_DTYPE)
        s = jax.lax.dot_general(q, k, (((1,), (1,)), ((), ())),
                                preferred_element_type=jnp.float32) + key_mask
        s = s - jnp.max(s, axis=-1, keepdims=True)
        p = jnp.exp(s)
        p = p / jnp.sum(p, axis=-1, keepdims=True)
        oh = jnp.dot(p.astype(MXU_DTYPE), v, preferred_element_type=jnp.float32)
        attn_proj = attn_proj + jnp.dot(oh.astype(MXU_DTYPE),
                                        wo[h * d:(h + 1) * d, :],
                                        preferred_element_type=jnp.float32)
    x = x + attn_proj + bo_ref[0]                    # residual

    # --- MLP block (pre-norm) -------------------------------------------------
    xn2 = layernorm(x, ln2_g_ref[0], ln2_b_ref[0])
    h1 = jnp.dot(xn2.astype(MXU_DTYPE), w1_ref[0],
                 preferred_element_type=jnp.float32) + b1_ref[0]
    # TODO(synk): PyTorch nn.GELU default is exact erf-GELU; tanh approximation
    # is used here (guaranteed Mosaic lowering).
    h1 = jax.nn.gelu(h1, approximate=True)
    x = x + jnp.dot(h1.astype(MXU_DTYPE), w2_ref[0],
                    preferred_element_type=jnp.float32) + b2_ref[0]

    x_scr[...] = x                                   # carry to next layer step

    # --- epilogue (last layer step): final LN on CLS row + classifier --------
    @pl.when(l == n_layers - 1)
    def _():
        cls = x[0:1, :]                              # (1, E)
        cls = layernorm(cls, fn_g_ref[...], fn_b_ref[...])
        logits = jnp.dot(cls.astype(MXU_DTYPE), out_w_ref[...],
                         preferred_element_type=jnp.float32) + out_b_ref[...]
        o_ref[0] = logits.astype(o_ref.dtype)


# ---------------------------------------------------------------------------
# Parameter init (deterministic, synthetic) -- packed for the fused kernel
# ---------------------------------------------------------------------------
def init_params(key, *, n_classes, img_size, patch_size, in_channels,
                embed_size, hidden_size, n_layers, attn_heads):
    del attn_heads  # head split is a view of the fused qkv projection
    T = (img_size // patch_size) ** 2
    S = T + 1
    S_pad = _round_up(S, 8)                      # sublane-aligned sequence
    Kd = in_channels * patch_size * patch_size
    Kd_pad = _round_up(Kd, _LANE)
    Npad = _round_up(n_classes, _LANE)
    E, Hd, L = embed_size, hidden_size, n_layers

    keys = jax.random.split(key, 4 + n_layers)

    def normal(k, shape, std=0.02):
        return (std * jax.random.normal(k, shape)).astype(jnp.float32)

    cls_emb = jnp.zeros((E,), jnp.float32)                       # zero init
    patch_w = normal(keys[0], (Kd, E))                           # conv -> matmul
    patch_b = jnp.zeros((E,), jnp.float32)
    pos_emb = normal(keys[1], (S, E))                            # N(0, 0.02)
    out_w = normal(keys[2], (E, n_classes))
    out_b = jnp.zeros((n_classes,), jnp.float32)

    # precomputed additive prologue tensor (cls token + pos emb + patch bias)
    add = jnp.zeros((S_pad, E), jnp.float32)
    add = add.at[0].set(cls_emb + pos_emb[0])
    add = add.at[1:S].set(patch_b[None, :] + pos_emb[1:])

    params = {
        "patch_w": jnp.pad(patch_w, ((0, Kd_pad - Kd), (0, 0))).astype(MXU_DTYPE),
        "add": add,
        "fn_g": jnp.ones((1, E), jnp.float32),
        "fn_b": jnp.zeros((1, E), jnp.float32),
        "out_w": jnp.pad(out_w, ((0, 0), (0, Npad - n_classes))).astype(MXU_DTYPE),
        "out_b": jnp.pad(out_b, (0, Npad - n_classes)).reshape(1, Npad),
    }

    lkeys = [jax.random.split(keys[4 + l], 4) for l in range(L)]
    params.update({
        "ln1_g": jnp.ones((L, 1, E), jnp.float32),
        "ln1_b": jnp.zeros((L, 1, E), jnp.float32),
        "wqkv": jnp.stack([normal(lkeys[l][0], (E, 3 * E)) for l in range(L)]
                          ).astype(MXU_DTYPE),
        "bqkv": jnp.zeros((L, 1, 3 * E), jnp.float32),
        "wo": jnp.stack([normal(lkeys[l][1], (E, E)) for l in range(L)]
                        ).astype(MXU_DTYPE),
        "bo": jnp.zeros((L, 1, E), jnp.float32),
        "ln2_g": jnp.ones((L, 1, E), jnp.float32),
        "ln2_b": jnp.zeros((L, 1, E), jnp.float32),
        "w1": jnp.stack([normal(lkeys[l][2], (E, Hd)) for l in range(L)]
                        ).astype(MXU_DTYPE),
        "b1": jnp.zeros((L, 1, Hd), jnp.float32),
        "w2": jnp.stack([normal(lkeys[l][3], (Hd, E)) for l in range(L)]
                        ).astype(MXU_DTYPE),
        "b2": jnp.zeros((L, 1, E), jnp.float32),
    })
    return params


# ---------------------------------------------------------------------------
# ViT forward: one pallas_call for the whole network
# ---------------------------------------------------------------------------
def vit_forward(params, X, *, patch_size, attn_heads, n_classes, eps=1e-5):
    B, C, H, W = X.shape
    P = patch_size
    T = (H // P) * (W // P)
    S = T + 1
    S_pad, E = params["add"].shape
    Kd = C * P * P
    Kd_pad = params["patch_w"].shape[0]
    Hd = params["w1"].shape[2]
    L = params["wqkv"].shape[0]
    Npad = params["out_w"].shape[1]
    scale = 1.0 / math.sqrt(E // attn_heads)

    # im2col for the patch conv (tiny one-time reshape; the conv itself is the
    # fused matmul inside the kernel).  Row 0 = cls slot, rows >T = seq padding.
    patches = X.reshape(B, C, H // P, P, W // P, P)
    patches = patches.transpose(0, 2, 4, 1, 3, 5).reshape(B, T, Kd)
    patches = jnp.pad(patches, ((0, 0), (1, S_pad - S), (0, Kd_pad - Kd)))

    def layer_spec(shape):                       # per-layer stacked params
        return pl.BlockSpec((1,) + shape, lambda b, l: (l, 0, 0))

    def const_spec(shape):                       # shared (layer-invariant) params
        nd = len(shape)
        return pl.BlockSpec(shape, lambda b, l: (0,) * nd)

    in_specs = [
        pl.BlockSpec((1, S_pad, Kd_pad), lambda b, l: (b, 0, 0)),  # patches
        const_spec((S_pad, E)),                                    # add
        const_spec((Kd_pad, E)),                                   # patch_w
        layer_spec((1, E)),                                        # ln1_g
        layer_spec((1, E)),                                        # ln1_b
        layer_spec((E, 3 * E)),                                    # wqkv
        layer_spec((1, 3 * E)),                                    # bqkv
        layer_spec((E, E)),                                        # wo
        layer_spec((1, E)),                                        # bo
        layer_spec((1, E)),                                        # ln2_g
        layer_spec((1, E)),                                        # ln2_b
        layer_spec((E, Hd)),                                       # w1
        layer_spec((1, Hd)),                                       # b1
        layer_spec((Hd, E)),                                       # w2
        layer_spec((1, E)),                                        # b2
        const_spec((1, E)),                                        # fn_g
        const_spec((1, E)),                                        # fn_b
        const_spec((E, Npad)),                                     # out_w
        const_spec((1, Npad)),                                     # out_b
    ]

    out = pl.pallas_call(
        functools.partial(_vit_kernel, n_heads=attn_heads, seq_len=S,
                          eps=eps, scale=scale),
        grid=(B, L),
        in_specs=in_specs,
        out_specs=pl.BlockSpec((1, 1, Npad), lambda b, l: (b, 0, 0)),
        out_shape=jax.ShapeDtypeStruct((B, 1, Npad), jnp.float32),
        scratch_shapes=[pltpu.VMEM((S_pad, E), jnp.float32)],   # residual carry
        compiler_params=pltpu.CompilerParams(
            dimension_semantics=("parallel", "arbitrary")),
    )(patches, params["add"], params["patch_w"],
      params["ln1_g"], params["ln1_b"], params["wqkv"], params["bqkv"],
      params["wo"], params["bo"],
      params["ln2_g"], params["ln2_b"], params["w1"], params["b1"],
      params["w2"], params["b2"],
      params["fn_g"], params["fn_b"], params["out_w"], params["out_b"])

    return out[:, 0, :n_classes]                 # drop lane padding of the head


if __name__ == "__main__":
    n_classes = 10
    img_size = 16
    patch_size = 4
    in_channels = 3
    embed_size = 128            # lane-friendly small config (head_dim = 32)
    hidden_size = 4 * 128
    n_layers = 2
    attn_heads = 4
    B = 2

    key = jax.random.PRNGKey(0)
    kp, kx = jax.random.split(key)
    params = init_params(kp, n_classes=n_classes, img_size=img_size,
                         patch_size=patch_size, in_channels=in_channels,
                         embed_size=embed_size, hidden_size=hidden_size,
                         n_layers=n_layers, attn_heads=attn_heads)
    X = jax.random.normal(kx, (B, in_channels, img_size, img_size), jnp.float32)

    fwd = jax.jit(functools.partial(vit_forward, patch_size=patch_size,
                                    attn_heads=attn_heads, n_classes=n_classes))
    y = jax.block_until_ready(fwd(params, X))
    assert y.shape == (B, n_classes), y.shape
    assert bool(jnp.all(jnp.isfinite(y))), "non-finite output"
    print("KERNEL_OK")
</pallas_src>

<mosaic_0001>
module attributes {stable_mosaic.version = 11 : i64} {
  func.func @_vit_kernel(%arg0: i32, %arg1: i32, %arg2: memref<1x24x128xf32, #tpu.memory_space<vmem>>, %arg3: memref<24x128xf32, #tpu.memory_space<vmem>>, %arg4: memref<128x128xbf16, #tpu.memory_space<vmem>>, %arg5: memref<1x1x128xf32, #tpu.memory_space<vmem>>, %arg6: memref<1x1x128xf32, #tpu.memory_space<vmem>>, %arg7: memref<1x128x384xbf16, #tpu.memory_space<vmem>>, %arg8: memref<1x1x384xf32, #tpu.memory_space<vmem>>, %arg9: memref<1x128x128xbf16, #tpu.memory_space<vmem>>, %arg10: memref<1x1x128xf32, #tpu.memory_space<vmem>>, %arg11: memref<1x1x128xf32, #tpu.memory_space<vmem>>, %arg12: memref<1x1x128xf32, #tpu.memory_space<vmem>>, %arg13: memref<1x128x512xbf16, #tpu.memory_space<vmem>>, %arg14: memref<1x1x512xf32, #tpu.memory_space<vmem>>, %arg15: memref<1x512x128xbf16, #tpu.memory_space<vmem>>, %arg16: memref<1x1x128xf32, #tpu.memory_space<vmem>>, %arg17: memref<1x128xf32, #tpu.memory_space<vmem>>, %arg18: memref<1x128xf32, #tpu.memory_space<vmem>>, %arg19: memref<128x128xbf16, #tpu.memory_space<vmem>>, %arg20: memref<1x128xf32, #tpu.memory_space<vmem>>, %arg21: memref<1x1x128xf32, #tpu.memory_space<vmem>>, %arg22: memref<24x128xf32, #tpu.memory_space<vmem>>) attributes {dimension_semantics = [#tpu.dimension_semantics<parallel>, #tpu.dimension_semantics<arbitrary>], iteration_bounds = array<i64: 2, 2>, scalar_prefetch = 0 : i64, scratch_operands = 1 : i64, tpu.core_type = #tpu.core_type<tc>, window_params = [{transform_indices = @transform_0, window_bounds = array<i64: 1, 24, 128>}, {pipeline_mode = #tpu.pipeline_mode<synchronous>, transform_indices = @transform_1, window_bounds = array<i64: 24, 128>}, {pipeline_mode = #tpu.pipeline_mode<synchronous>, transform_indices = @transform_2, window_bounds = array<i64: 128, 128>}, {transform_indices = @transform_3, window_bounds = array<i64: 1, 1, 128>}, {transform_indices = @transform_4, window_bounds = array<i64: 1, 1, 128>}, {transform_indices = @transform_5, window_bounds = array<i64: 1, 128, 384>}, {transform_indices = @transform_6, window_bounds = array<i64: 1, 1, 384>}, {transform_indices = @transform_7, window_bounds = array<i64: 1, 128, 128>}, {transform_indices = @transform_8, window_bounds = array<i64: 1, 1, 128>}, {transform_indices = @transform_9, window_bounds = array<i64: 1, 1, 128>}, {transform_indices = @transform_10, window_bounds = array<i64: 1, 1, 128>}, {transform_indices = @transform_11, window_bounds = array<i64: 1, 128, 512>}, {transform_indices = @transform_12, window_bounds = array<i64: 1, 1, 512>}, {transform_indices = @transform_13, window_bounds = array<i64: 1, 512, 128>}, {transform_indices = @transform_14, window_bounds = array<i64: 1, 1, 128>}, {pipeline_mode = #tpu.pipeline_mode<synchronous>, transform_indices = @transform_15, window_bounds = array<i64: 1, 128>}, {pipeline_mode = #tpu.pipeline_mode<synchronous>, transform_indices = @transform_16, window_bounds = array<i64: 1, 128>}, {pipeline_mode = #tpu.pipeline_mode<synchronous>, transform_indices = @transform_17, window_bounds = array<i64: 128, 128>}, {pipeline_mode = #tpu.pipeline_mode<synchronous>, transform_indices = @transform_18, window_bounds = array<i64: 1, 128>}, {transform_indices = @transform_19, window_bounds = array<i64: 1, 1, 128>}]} {
    %c0_i32 = arith.constant 0 : i32
    %0 = arith.cmpi eq, %arg1, %c0_i32 : i32
    %1 = arith.extui %0 : i1 to i32
    %c0_i32_0 = arith.constant 0 : i32
    %2 = arith.cmpi ne, %1, %c0_i32_0 : i32
    scf.if %2 {
      %c0_84 = arith.constant 0 : index
      %c0_85 = arith.constant 0 : index
      %c0_86 = arith.constant 0 : index
      %212 = vector.load %arg2[%c0_84, %c0_85, %c0_86] : memref<1x24x128xf32, #tpu.memory_space<vmem>>, vector<1x24x128xf32>
      %213 = vector.shape_cast %212 : vector<1x24x128xf32> to vector<24x128xf32>
      %214 = arith.truncf %213 : vector<24x128xf32> to vector<24x128xbf16>
      %c0_87 = arith.constant 0 : index
      %c0_88 = arith.constant 0 : index
      %215 = vector.load %arg4[%c0_87, %c0_88] : memref<128x128xbf16, #tpu.memory_space<vmem>>, vector<128x128xbf16>
      %cst_89 = arith.constant dense<0.000000e+00> : vector<24x128xf32>
      %216 = tpu.matmul %214, %215, %cst_89 {dimension_numbers = #tpu.dot_dimension_numbers<[1], [0], [0], [1], [0, 0, 1, 1], [], []>} : vector<24x128xbf16>, vector<128x128xbf16>, vector<24x128xf32> -> vector<24x128xf32>
      %c0_90 = arith.constant 0 : index
      %c0_91 = arith.constant 0 : index
      %217 = vector.load %arg3[%c0_90, %c0_91] : memref<24x128xf32, #tpu.memory_space<vmem>>, vector<24x128xf32>
      %218 = arith.addf %216, %217 : vector<24x128xf32>
      %c0_92 = arith.constant 0 : index
      %c0_93 = arith.constant 0 : index
      %219 = vector.load %arg22[%c0_92, %c0_93] : memref<24x128xf32, #tpu.memory_space<vmem>>, vector<24x128xf32>
      tpu.vector_store %arg22[%c0_92, %c0_93], %218 {strides = array<i32>} : memref<24x128xf32, #tpu.memory_space<vmem>>, vector<24x128xf32>,
    } else {
    }
    %c0 = arith.constant 0 : index
    %c0_1 = arith.constant 0 : index
    %3 = vector.load %arg22[%c0, %c0_1] : memref<24x128xf32, #tpu.memory_space<vmem>>, vector<24x128xf32>
    %c0_2 = arith.constant 0 : index
    %c0_3 = arith.constant 0 : index
    %c0_4 = arith.constant 0 : index
    %4 = vector.load %arg5[%c0_2, %c0_3, %c0_4] : memref<1x1x128xf32, #tpu.memory_space<vmem>>, vector<1x1x128xf32>
    %5 = vector.shape_cast %4 : vector<1x1x128xf32> to vector<1x128xf32>
    %c0_5 = arith.constant 0 : index
    %c0_6 = arith.constant 0 : index
    %c0_7 = arith.constant 0 : index
    %6 = vector.load %arg6[%c0_5, %c0_6, %c0_7] : memref<1x1x128xf32, #tpu.memory_space<vmem>>, vector<1x1x128xf32>
    %7 = vector.shape_cast %6 : vector<1x1x128xf32> to vector<1x128xf32>
    %cst = arith.constant dense<0.000000e+00> : vector<24xf32>
    %8 = vector.multi_reduction <add>, %3, %cst [1] : vector<24x128xf32> to vector<24xf32>
    %9 = vector.shape_cast %8 : vector<24xf32> to vector<24x1xf32>
    %cst_8 = arith.constant 1.280000e+02 : f32
    %10 = vector.broadcast %cst_8 : f32 to vector<24x1xf32>
    %11 = arith.divf %9, %10 : vector<24x1xf32>
    %12 = vector.broadcast %11 : vector<24x1xf32> to vector<24x128xf32>
    %13 = arith.subf %3, %12 : vector<24x128xf32>
    %14 = arith.mulf %13, %13 : vector<24x128xf32>
    %cst_9 = arith.constant dense<0.000000e+00> : vector<24xf32>
    %15 = vector.multi_reduction <add>, %14, %cst_9 [1] : vector<24x128xf32> to vector<24xf32>
    %16 = vector.shape_cast %15 : vector<24xf32> to vector<24x1xf32>
    %cst_10 = arith.constant 1.280000e+02 : f32
    %17 = vector.broadcast %cst_10 : f32 to vector<24x1xf32>
    %18 = arith.divf %16, %17 : vector<24x1xf32>
    %cst_11 = arith.constant 9.99999974E-6 : f32
    %19 = vector.broadcast %cst_11 : f32 to vector<24x1xf32>
    %20 = arith.addf %18, %19 : vector<24x1xf32>
    %21 = math.rsqrt %20 : vector<24x1xf32>
    %22 = vector.broadcast %21 : vector<24x1xf32> to vector<24x128xf32>
    %23 = arith.mulf %13, %22 : vector<24x128xf32>
    %24 = vector.broadcast %5 : vector<1x128xf32> to vector<24x128xf32>
    %25 = arith.mulf %23, %24 : vector<24x128xf32>
    %26 = vector.broadcast %7 : vector<1x128xf32> to vector<24x128xf32>
    %27 = arith.addf %25, %26 : vector<24x128xf32>
    %28 = arith.truncf %27 : vector<24x128xf32> to vector<24x128xbf16>
    %c0_12 = arith.constant 0 : index
    %c0_13 = arith.constant 0 : index
    %c0_14 = arith.constant 0 : index
    %29 = vector.load %arg7[%c0_12, %c0_13, %c0_14] : memref<1x128x384xbf16, #tpu.memory_space<vmem>>, vector<1x128x384xbf16>
    %30 = vector.shape_cast %29 : vector<1x128x384xbf16> to vector<128x384xbf16>
    %cst_15 = arith.constant dense<0.000000e+00> : vector<24x384xf32>
    %31 = tpu.matmul %28, %30, %cst_15 {dimension_numbers = #tpu.dot_dimension_numbers<[1], [0], [0], [1], [0, 0, 1, 1], [], []>} : vector<24x128xbf16>, vector<128x384xbf16>, vector<24x384xf32> -> vector<24x384xf32>
    %c0_16 = arith.constant 0 : index
    %c0_17 = arith.constant 0 : index
    %c0_18 = arith.constant 0 : index
    %32 = vector.load %arg8[%c0_16, %c0_17, %c0_18] : memref<1x1x384xf32, #tpu.memory_space<vmem>>, vector<1x1x384xf32>
    %33 = vector.shape_cast %32 : vector<1x1x384xf32> to vector<1x384xf32>
    %34 = vector.broadcast %33 : vector<1x384xf32> to vector<24x384xf32>
    %35 = arith.addf %31, %34 : vector<24x384xf32>
    %36 = tpu.iota {dimensions = array<i32: 1>} : vector<1x24xi32>
    %c17_i32 = arith.constant 17 : i32
    %37 = vector.broadcast %c17_i32 : i32 to vector<1x24xi32>
    %38 = arith.cmpi slt, %36, %37 : vector<1x24xi32>
    %cst_19 = arith.constant 0.000000e+00 : f32
    %cst_20 = arith.constant -1.000000e+30 : f32
    %39 = vector.broadcast %cst_19 : f32 to vector<1x24xf32>
    %40 = vector.broadcast %cst_20 : f32 to vector<1x24xf32>
    %41 = arith.select %38, %39, %40 : vector<1x24xi1>, vector<1x24xf32>
    %c0_21 = arith.constant 0 : index
    %c0_22 = arith.constant 0 : index
    %c0_23 = arith.constant 0 : index
    %42 = vector.load %arg9[%c0_21, %c0_22, %c0_23] : memref<1x128x128xbf16, #tpu.memory_space<vmem>>, vector<1x128x128xbf16>
    %43 = vector.shape_cast %42 : vector<1x128x128xbf16> to vector<128x128xbf16>
    %cst_24 = arith.constant 0.000000e+00 : f32
    %44 = vector.broadcast %cst_24 : f32 to vector<24x128xf32>
    %45 = vector.extract_strided_slice %35 {offsets = [0, 0], sizes = [24, 32], strides = [1, 1]} : vector<24x384xf32> to vector<24x32xf32>
    %cst_25 = arith.constant 0.176776692 : f32
    %46 = vector.broadcast %cst_25 : f32 to vector<24x32xf32>
    %47 = arith.mulf %45, %46 : vector<24x32xf32>
    %48 = arith.truncf %47 : vector<24x32xf32> to vector<24x32xbf16>
    %49 = vector.extract_strided_slice %35 {offsets = [0, 128], sizes = [24, 32], strides = [1, 1]} : vector<24x384xf32> to vector<24x32xf32>
    %50 = arith.truncf %49 : vector<24x32xf32> to vector<24x32xbf16>
    %51 = vector.extract_strided_slice %35 {offsets = [0, 256], sizes = [24, 32], strides = [1, 1]} : vector<24x384xf32> to vector<24x32xf32>
    %52 = arith.truncf %51 : vector<24x32xf32> to vector<24x32xbf16>
    %cst_26 = arith.constant dense<0.000000e+00> : vector<24x24xf32>
    %53 = tpu.matmul %48, %50, %cst_26 {dimension_numbers = #tpu.dot_dimension_numbers<[1], [1], [0], [0], [0, 0, 1, 0], [], []>} : vector<24x32xbf16>, vector<24x32xbf16>, vector<24x24xf32> -> vector<24x24xf32>
    %54 = vector.broadcast %41 : vector<1x24xf32> to vector<24x24xf32>
    %55 = arith.addf %53, %54 : vector<24x24xf32>
    %cst_27 = arith.constant dense<0xFF800000> : vector<24xf32>
    %56 = vector.multi_reduction <maximumf>, %55, %cst_27 [1] : vector<24x24xf32> to vector<24xf32>
    %57 = vector.shape_cast %56 : vector<24xf32> to vector<24x1xf32>
    %58 = vector.broadcast %57 : vector<24x1xf32> to vector<24x24xf32>
    %59 = arith.subf %55, %58 : vector<24x24xf32>
    %60 = math.exp %59 : vector<24x24xf32>
    %cst_28 = arith.constant dense<0.000000e+00> : vector<24xf32>
    %61 = vector.multi_reduction <add>, %60, %cst_28 [1] : vector<24x24xf32> to vector<24xf32>
    %62 = vector.shape_cast %61 : vector<24xf32> to vector<24x1xf32>
    %63 = vector.broadcast %62 : vector<24x1xf32> to vector<24x24xf32>
    %64 = arith.divf %60, %63 : vector<24x24xf32>
    %65 = arith.truncf %64 : vector<24x24xf32> to vector<24x24xbf16>
    %cst_29 = arith.constant dense<0.000000e+00> : vector<24x32xf32>
    %66 = tpu.matmul %65, %52, %cst_29 {dimension_numbers = #tpu.dot_dimension_numbers<[1], [0], [0], [1], [0, 0, 1, 1], [], []>} : vector<24x24xbf16>, vector<24x32xbf16>, vector<24x32xf32> -> vector<24x32xf32>
    %67 = arith.truncf %66 : vector<24x32xf32> to vector<24x32xbf16>
    %68 = vector.extract_strided_slice %43 {offsets = [0, 0], sizes = [32, 128], strides = [1, 1]} : vector<128x128xbf16> to vector<32x128xbf16>
    %cst_30 = arith.constant dense<0.000000e+00> : vector<24x128xf32>
    %69 = tpu.matmul %67, %68, %cst_30 {dimension_numbers = #tpu.dot_dimension_numbers<[1], [0], [0], [1], [0, 0, 1, 1], [], []>} : vector<24x32xbf16>, vector<32x128xbf16>, vector<24x128xf32> -> vector<24x128xf32>
    %70 = arith.addf %44, %69 : vector<24x128xf32>
    %71 = vector.extract_strided_slice %35 {offsets = [0, 32], sizes = [24, 32], strides = [1, 1]} : vector<24x384xf32> to vector<24x32xf32>
    %cst_31 = arith.constant 0.176776692 : f32
    %72 = vector.broadcast %cst_31 : f32 to vector<24x32xf32>
    %73 = arith.mulf %71, %72 : vector<24x32xf32>
    %74 = arith.truncf %73 : vector<24x32xf32> to vector<24x32xbf16>
    %75 = vector.extract_strided_slice %35 {offsets = [0, 160], sizes = [24, 32], strides = [1, 1]} : vector<24x384xf32> to vector<24x32xf32>
    %76 = arith.truncf %75 : vector<24x32xf32> to vector<24x32xbf16>
    %77 = vector.extract_strided_slice %35 {offsets = [0, 288], sizes = [24, 32], strides = [1, 1]} : vector<24x384xf32> to vector<24x32xf32>
    %78 = arith.truncf %77 : vector<24x32xf32> to vector<24x32xbf16>
    %cst_32 = arith.constant dense<0.000000e+00> : vector<24x24xf32>
    %79 = tpu.matmul %74, %76, %cst_32 {dimension_numbers = #tpu.dot_dimension_numbers<[1], [1], [0], [0], [0, 0, 1, 0], [], []>} : vector<24x32xbf16>, vector<24x32xbf16>, vector<24x24xf32> -> vector<24x24xf32>
    %80 = vector.broadcast %41 : vector<1x24xf32> to vector<24x24xf32>
    %81 = arith.addf %79, %80 : vector<24x24xf32>
    %cst_33 = arith.constant dense<0xFF800000> : vector<24xf32>
    %82 = vector.multi_reduction <maximumf>, %81, %cst_33 [1] : vector<24x24xf32> to vector<24xf32>
    %83 = vector.shape_cast %82 : vector<24xf32> to vector<24x1xf32>
    %84 = vector.broadcast %83 : vector<24x1xf32> to vector<24x24xf32>
    %85 = arith.subf %81, %84 : vector<24x24xf32>
    %86 = math.exp %85 : vector<24x24xf32>
    %cst_34 = arith.constant dense<0.000000e+00> : vector<24xf32>
    %87 = vector.multi_reduction <add>, %86, %cst_34 [1] : vector<24x24xf32> to vector<24xf32>
    %88 = vector.shape_cast %87 : vector<24xf32> to vector<24x1xf32>
    %89 = vector.broadcast %88 : vector<24x1xf32> to vector<24x24xf32>
    %90 = arith.divf %86, %89 : vector<24x24xf32>
    %91 = arith.truncf %90 : vector<24x24xf32> to vector<24x24xbf16>
    %cst_35 = arith.constant dense<0.000000e+00> : vector<24x32xf32>
    %92 = tpu.matmul %91, %78, %cst_35 {dimension_numbers = #tpu.dot_dimension_numbers<[1], [0], [0], [1], [0, 0, 1, 1], [], []>} : vector<24x24xbf16>, vector<24x32xbf16>, vector<24x32xf32> -> vector<24x32xf32>
    %93 = arith.truncf %92 : vector<24x32xf32> to vector<24x32xbf16>
    %94 = vector.extract_strided_slice %43 {offsets = [32, 0], sizes = [32, 128], strides = [1, 1]} : vector<128x128xbf16> to vector<32x128xbf16>
    %cst_36 = arith.constant dense<0.000000e+00> : vector<24x128xf32>
    %95 = tpu.matmul %93, %94, %cst_36 {dimension_numbers = #tpu.dot_dimension_numbers<[1], [0], [0], [1], [0, 0, 1, 1], [], []>} : vector<24x32xbf16>, vector<32x128xbf16>, vector<24x128xf32> -> vector<24x128xf32>
    %96 = arith.addf %70, %95 : vector<24x128xf32>
    %97 = vector.extract_strided_slice %35 {offsets = [0, 64], sizes = [24, 32], strides = [1, 1]} : vector<24x384xf32> to vector<24x32xf32>
    %cst_37 = arith.constant 0.176776692 : f32
    %98 = vector.broadcast %cst_37 : f32 to vector<24x32xf32>
    %99 = arith.mulf %97, %98 : vector<24x32xf32>
    %100 = arith.truncf %99 : vector<24x32xf32> to vector<24x32xbf16>
    %101 = vector.extract_strided_slice %35 {offsets = [0, 192], sizes = [24, 32], strides = [1, 1]} : vector<24x384xf32> to vector<24x32xf32>
    %102 = arith.truncf %101 : vector<24x32xf32> to vector<24x32xbf16>
    %103 = vector.extract_strided_slice %35 {offsets = [0, 320], sizes = [24, 32], strides = [1, 1]} : vector<24x384xf32> to vector<24x32xf32>
    %104 = arith.truncf %103 : vector<24x32xf32> to vector<24x32xbf16>
    %cst_38 = arith.constant dense<0.000000e+00> : vector<24x24xf32>
    %105 = tpu.matmul %100, %102, %cst_38 {dimension_numbers = #tpu.dot_dimension_numbers<[1], [1], [0], [0], [0, 0, 1, 0], [], []>} : vector<24x32xbf16>, vector<24x32xbf16>, vector<24x24xf32> -> vector<24x24xf32>
    %106 = vector.broadcast %41 : vector<1x24xf32> to vector<24x24xf32>
    %107 = arith.addf %105, %106 : vector<24x24xf32>
    %cst_39 = arith.constant dense<0xFF800000> : vector<24xf32>
    %108 = vector.multi_reduction <maximumf>, %107, %cst_39 [1] : vector<24x24xf32> to vector<24xf32>
    %109 = vector.shape_cast %108 : vector<24xf32> to vector<24x1xf32>
    %110 = vector.broadcast %109 : vector<24x1xf32> to vector<24x24xf32>
    %111 = arith.subf %107, %110 : vector<24x24xf32>
    %112 = math.exp %111 : vector<24x24xf32>
    %cst_40 = arith.constant dense<0.000000e+00> : vector<24xf32>
    %113 = vector.multi_reduction <add>, %112, %cst_40 [1] : vector<24x24xf32> to vector<24xf32>
    %114 = vector.shape_cast %113 : vector<24xf32> to vector<24x1xf32>
    %115 = vector.broadcast %114 : vector<24x1xf32> to vector<24x24xf32>
    %116 = arith.divf %112, %115 : vector<24x24xf32>
    %117 = arith.truncf %116 : vector<24x24xf32> to vector<24x24xbf16>
    %cst_41 = arith.constant dense<0.000000e+00> : vector<24x32xf32>
    %118 = tpu.matmul %117, %104, %cst_41 {dimension_numbers = #tpu.dot_dimension_numbers<[1], [0], [0], [1], [0, 0, 1, 1], [], []>} : vector<24x24xbf16>, vector<24x32xbf16>, vector<24x32xf32> -> vector<24x32xf32>
    %119 = arith.truncf %118 : vector<24x32xf32> to vector<24x32xbf16>
    %120 = vector.extract_strided_slice %43 {offsets = [64, 0], sizes = [32, 128], strides = [1, 1]} : vector<128x128xbf16> to vector<32x128xbf16>
    %cst_42 = arith.constant dense<0.000000e+00> : vector<24x128xf32>
    %121 = tpu.matmul %119, %120, %cst_42 {dimension_numbers = #tpu.dot_dimension_numbers<[1], [0], [0], [1], [0, 0, 1, 1], [], []>} : vector<24x32xbf16>, vector<32x128xbf16>, vector<24x128xf32> -> vector<24x128xf32>
    %122 = arith.addf %96, %121 : vector<24x128xf32>
    %123 = vector.extract_strided_slice %35 {offsets = [0, 96], sizes = [24, 32], strides = [1, 1]} : vector<24x384xf32> to vector<24x32xf32>
    %cst_43 = arith.constant 0.176776692 : f32
    %124 = vector.broadcast %cst_43 : f32 to vector<24x32xf32>
    %125 = arith.mulf %123, %124 : vector<24x32xf32>
    %126 = arith.truncf %125 : vector<24x32xf32> to vector<24x32xbf16>
    %127 = vector.extract_strided_slice %35 {offsets = [0, 224], sizes = [24, 32], strides = [1, 1]} : vector<24x384xf32> to vector<24x32xf32>
    %128 = arith.truncf %127 : vector<24x32xf32> to vector<24x32xbf16>
    %129 = vector.extract_strided_slice %35 {offsets = [0, 352], sizes = [24, 32], strides = [1, 1]} : vector<24x384xf32> to vector<24x32xf32>
    %130 = arith.truncf %129 : vector<24x32xf32> to vector<24x32xbf16>
    %cst_44 = arith.constant dense<0.000000e+00> : vector<24x24xf32>
    %131 = tpu.matmul %126, %128, %cst_44 {dimension_numbers = #tpu.dot_dimension_numbers<[1], [1], [0], [0], [0, 0, 1, 0], [], []>} : vector<24x32xbf16>, vector<24x32xbf16>, vector<24x24xf32> -> vector<24x24xf32>
    %132 = vector.broadcast %41 : vector<1x24xf32> to vector<24x24xf32>
    %133 = arith.addf %131, %132 : vector<24x24xf32>
    %cst_45 = arith.constant dense<0xFF800000> : vector<24xf32>
    %134 = vector.multi_reduction <maximumf>, %133, %cst_45 [1] : vector<24x24xf32> to vector<24xf32>
    %135 = vector.shape_cast %134 : vector<24xf32> to vector<24x1xf32>
    %136 = vector.broadcast %135 : vector<24x1xf32> to vector<24x24xf32>
    %137 = arith.subf %133, %136 : vector<24x24xf32>
    %138 = math.exp %137 : vector<24x24xf32>
    %cst_46 = arith.constant dense<0.000000e+00> : vector<24xf32>
    %139 = vector.multi_reduction <add>, %138, %cst_46 [1] : vector<24x24xf32> to vector<24xf32>
    %140 = vector.shape_cast %139 : vector<24xf32> to vector<24x1xf32>
    %141 = vector.broadcast %140 : vector<24x1xf32> to vector<24x24xf32>
    %142 = arith.divf %138, %141 : vector<24x24xf32>
    %143 = arith.truncf %142 : vector<24x24xf32> to vector<24x24xbf16>
    %cst_47 = arith.constant dense<0.000000e+00> : vector<24x32xf32>
    %144 = tpu.matmul %143, %130, %cst_47 {dimension_numbers = #tpu.dot_dimension_numbers<[1], [0], [0], [1], [0, 0, 1, 1], [], []>} : vector<24x24xbf16>, vector<24x32xbf16>, vector<24x32xf32> -> vector<24x32xf32>
    %145 = arith.truncf %144 : vector<24x32xf32> to vector<24x32xbf16>
    %146 = vector.extract_strided_slice %43 {offsets = [96, 0], sizes = [32, 128], strides = [1, 1]} : vector<128x128xbf16> to vector<32x128xbf16>
    %cst_48 = arith.constant dense<0.000000e+00> : vector<24x128xf32>
    %147 = tpu.matmul %145, %146, %cst_48 {dimension_numbers = #tpu.dot_dimension_numbers<[1], [0], [0], [1], [0, 0, 1, 1], [], []>} : vector<24x32xbf16>, vector<32x128xbf16>, vector<24x128xf32> -> vector<24x128xf32>
    %148 = arith.addf %122, %147 : vector<24x128xf32>
    %149 = arith.addf %3, %148 : vector<24x128xf32>
    %c0_49 = arith.constant 0 : index
    %c0_50 = arith.constant 0 : index
    %c0_51 = arith.constant 0 : index
    %150 = vector.load %arg10[%c0_49, %c0_50, %c0_51] : memref<1x1x128xf32, #tpu.memory_space<vmem>>, vector<1x1x128xf32>
    %151 = vector.shape_cast %150 : vector<1x1x128xf32> to vector<1x128xf32>
    %152 = vector.broadcast %151 : vector<1x128xf32> to vector<24x128xf32>
    %153 = arith.addf %149, %152 : vector<24x128xf32>
    %c0_52 = arith.constant 0 : index
    %c0_53 = arith.constant 0 : index
    %c0_54 = arith.constant 0 : index
    %154 = vector.load %arg11[%c0_52, %c0_53, %c0_54] : memref<1x1x128xf32, #tpu.memory_space<vmem>>, vector<1x1x128xf32>
    %155 = vector.shape_cast %154 : vector<1x1x128xf32> to vector<1x128xf32>
    %c0_55 = arith.constant 0 : index
    %c0_56 = arith.constant 0 : index
    %c0_57 = arith.constant 0 : index
    %156 = vector.load %arg12[%c0_55, %c0_56, %c0_57] : memref<1x1x128xf32, #tpu.memory_space<vmem>>, vector<1x1x128xf32>
    %157 = vector.shape_cast %156 : vector<1x1x128xf32> to vector<1x128xf32>
    %cst_58 = arith.constant dense<0.000000e+00> : vector<24xf32>
    %158 = vector.multi_reduction <add>, %153, %cst_58 [1] : vector<24x128xf32> to vector<24xf32>
    %159 = vector.shape_cast %158 : vector<24xf32> to vector<24x1xf32>
    %cst_59 = arith.constant 1.280000e+02 : f32
    %160 = vector.broadcast %cst_59 : f32 to vector<24x1xf32>
    %161 = arith.divf %159, %160 : vector<24x1xf32>
    %162 = vector.broadcast %161 : vector<24x1xf32> to vector<24x128xf32>
    %163 = arith.subf %153, %162 : vector<24x128xf32>
    %164 = arith.mulf %163, %163 : vector<24x128xf32>
    %cst_60 = arith.constant dense<0.000000e+00> : vector<24xf32>
    %165 = vector.multi_reduction <add>, %164, %cst_60 [1] : vector<24x128xf32> to vector<24xf32>
    %166 = vector.shape_cast %165 : vector<24xf32> to vector<24x1xf32>
    %cst_61 = arith.constant 1.280000e+02 : f32
    %167 = vector.broadcast %cst_61 : f32 to vector<24x1xf32>
    %168 = arith.divf %166, %167 : vector<24x1xf32>
    %cst_62 = arith.constant 9.99999974E-6 : f32
    %169 = vector.broadcast %cst_62 : f32 to vector<24x1xf32>
    %170 = arith.addf %168, %169 : vector<24x1xf32>
    %171 = math.rsqrt %170 : vector<24x1xf32>
    %172 = vector.broadcast %171 : vector<24x1xf32> to vector<24x128xf32>
    %173 = arith.mulf %163, %172 : vector<24x128xf32>
    %174 = vector.broadcast %155 : vector<1x128xf32> to vector<24x128xf32>
    %175 = arith.mulf %173, %174 : vector<24x128xf32>
    %176 = vector.broadcast %157 : vector<1x128xf32> to vector<24x128xf32>
    %177 = arith.addf %175, %176 : vector<24x128xf32>
    %178 = arith.truncf %177 : vector<24x128xf32> to vector<24x128xbf16>
    %c0_63 = arith.constant 0 : index
    %c0_64 = arith.constant 0 : index
    %c0_65 = arith.constant 0 : index
    %179 = vector.load %arg13[%c0_63, %c0_64, %c0_65] : memref<1x128x512xbf16, #tpu.memory_space<vmem>>, vector<1x128x512xbf16>
    %180 = vector.shape_cast %179 : vector<1x128x512xbf16> to vector<128x512xbf16>
    %cst_66 = arith.constant dense<0.000000e+00> : vector<24x512xf32>
    %181 = tpu.matmul %178, %180, %cst_66 {dimension_numbers = #tpu.dot_dimension_numbers<[1], [0], [0], [1], [0, 0, 1, 1], [], []>} : vector<24x128xbf16>, vector<128x512xbf16>, vector<24x512xf32> -> vector<24x512xf32>
    %c0_67 = arith.constant 0 : index
    %c0_68 = arith.constant 0 : index
    %c0_69 = arith.constant 0 : index
    %182 = vector.load %arg14[%c0_67, %c0_68, %c0_69] : memref<1x1x512xf32, #tpu.memory_space<vmem>>, vector<1x1x512xf32>
    %183 = vector.shape_cast %182 : vector<1x1x512xf32> to vector<1x512xf32>
    %184 = vector.broadcast %183 : vector<1x512xf32> to vector<24x512xf32>
    %185 = arith.addf %181, %184 : vector<24x512xf32>
    %186 = arith.mulf %185, %185 : vector<24x512xf32>
    %187 = arith.mulf %185, %186 : vector<24x512xf32>
    %cst_70 = arith.constant 4.471500e-02 : f32
    %188 = vector.broadcast %cst_70 : f32 to vector<24x512xf32>
    %189 = arith.mulf %188, %187 : vector<24x512xf32>
    %190 = arith.addf %185, %189 : vector<24x512xf32>
    %cst_71 = arith.constant 0.797884583 : f32
    %191 = vector.broadcast %cst_71 : f32 to vector<24x512xf32>
    %192 = arith.mulf %191, %190 : vector<24x512xf32>
    %193 = math.tanh %192 : vector<24x512xf32>
    %cst_72 = arith.constant 1.000000e+00 : f32
    %194 = vector.broadcast %cst_72 : f32 to vector<24x512xf32>
    %195 = arith.addf %194, %193 : vector<24x512xf32>
    %cst_73 = arith.constant 5.000000e-01 : f32
    %196 = vector.broadcast %cst_73 : f32 to vector<24x512xf32>
    %197 = arith.mulf %196, %195 : vector<24x512xf32>
    %198 = arith.mulf %185, %197 : vector<24x512xf32>
    %199 = arith.truncf %198 : vector<24x512xf32> to vector<24x512xbf16>
    %c0_74 = arith.constant 0 : index
    %c0_75 = arith.constant 0 : index
    %c0_76 = arith.constant 0 : index
    %200 = vector.load %arg15[%c0_74, %c0_75, %c0_76] : memref<1x512x128xbf16, #tpu.memory_space<vmem>>, vector<1x512x128xbf16>
    %201 = vector.shape_cast %200 : vector<1x512x128xbf16> to vector<512x128xbf16>
    %cst_77 = arith.constant dense<0.000000e+00> : vector<24x128xf32>
    %202 = tpu.matmul %199, %201, %cst_77 {dimension_numbers = #tpu.dot_dimension_numbers<[1], [0], [0], [1], [0, 0, 1, 1], [], []>} : vector<24x512xbf16>, vector<512x128xbf16>, vector<24x128xf32> -> vector<24x128xf32>
    %203 = arith.addf %153, %202 : vector<24x128xf32>
    %c0_78 = arith.constant 0 : index
    %c0_79 = arith.constant 0 : index
    %c0_80 = arith.constant 0 : index
    %204 = vector.load %arg16[%c0_78, %c0_79, %c0_80] : memref<1x1x128xf32, #tpu.memory_space<vmem>>, vector<1x1x128xf32>
    %205 = vector.shape_cast %204 : vector<1x1x128xf32> to vector<1x128xf32>
    %206 = vector.broadcast %205 : vector<1x128xf32> to vector<24x128xf32>
    %207 = arith.addf %203, %206 : vector<24x128xf32>
    %c0_81 = arith.constant 0 : index
    %c0_82 = arith.constant 0 : index
    %208 = vector.load %arg22[%c0_81, %c0_82] : memref<24x128xf32, #tpu.memory_space<vmem>>, vector<24x128xf32>
    tpu.vector_store %arg22[%c0_81, %c0_82], %207 {strides = array<i32>} : memref<24x128xf32, #tpu.memory_space<vmem>>, vector<24x128xf32>,
    %c1_i32 = arith.constant 1 : i32
    %209 = arith.cmpi eq, %arg1, %c1_i32 : i32
    %210 = arith.extui %209 : i1 to i32
    %c0_i32_83 = arith.constant 0 : i32
    %211 = arith.cmpi ne, %210, %c0_i32_83 : i32
    scf.if %211 {
      %212 = vector.extract_strided_slice %207 {offsets = [0, 0], sizes = [1, 128], strides = [1, 1]} : vector<24x128xf32> to vector<1x128xf32>
      %c0_84 = arith.constant 0 : index
      %c0_85 = arith.constant 0 : index
      %213 = vector.load %arg17[%c0_84, %c0_85] : memref<1x128xf32, #tpu.memory_space<vmem>>, vector<1x128xf32>
      %c0_86 = arith.constant 0 : index
      %c0_87 = arith.constant 0 : index
      %214 = vector.load %arg18[%c0_86, %c0_87] : memref<1x128xf32, #tpu.memory_space<vmem>>, vector<1x128xf32>
      %cst_88 = arith.constant dense<0.000000e+00> : vector<1xf32>
      %215 = vector.multi_reduction <add>, %212, %cst_88 [1] : vector<1x128xf32> to vector<1xf32>
      %216 = vector.shape_cast %215 : vector<1xf32> to vector<1x1xf32>
      %cst_89 = arith.constant 1.280000e+02 : f32
      %217 = vector.broadcast %cst_89 : f32 to vector<1x1xf32>
      %218 = arith.divf %216, %217 : vector<1x1xf32>
      %219 = vector.broadcast %218 : vector<1x1xf32> to vector<1x128xf32>
      %220 = arith.subf %212, %219 : vector<1x128xf32>
      %221 = arith.mulf %220, %220 : vector<1x128xf32>
      %cst_90 = arith.constant dense<0.000000e+00> : vector<1xf32>
      %222 = vector.multi_reduction <add>, %221, %cst_90 [1] : vector<1x128xf32> to vector<1xf32>
      %223 = vector.shape_cast %222 : vector<1xf32> to vector<1x1xf32>
      %cst_91 = arith.constant 1.280000e+02 : f32
      %224 = vector.broadcast %cst_91 : f32 to vector<1x1xf32>
      %225 = arith.divf %223, %224 : vector<1x1xf32>
      %cst_92 = arith.constant 9.99999974E-6 : f32
      %226 = vector.broadcast %cst_92 : f32 to vector<1x1xf32>
      %227 = arith.addf %225, %226 : vector<1x1xf32>
      %228 = math.rsqrt %227 : vector<1x1xf32>
      %229 = vector.broadcast %228 : vector<1x1xf32> to vector<1x128xf32>
      %230 = arith.mulf %220, %229 : vector<1x128xf32>
      %231 = arith.mulf %230, %213 : vector<1x128xf32>
      %232 = arith.addf %231, %214 : vector<1x128xf32>
      %233 = arith.truncf %232 : vector<1x128xf32> to vector<1x128xbf16>
      %c0_93 = arith.constant 0 : index
      %c0_94 = arith.constant 0 : index
      %234 = vector.load %arg19[%c0_93, %c0_94] : memref<128x128xbf16, #tpu.memory_space<vmem>>, vector<128x128xbf16>
      %cst_95 = arith.constant dense<0.000000e+00> : vector<1x128xf32>
      %235 = tpu.matmul %233, %234, %cst_95 {dimension_numbers = #tpu.dot_dimension_numbers<[1], [0], [0], [1], [0, 0, 1, 1], [], []>} : vector<1x128xbf16>, vector<128x128xbf16>, vector<1x128xf32> -> vector<1x128xf32>
      %c0_96 = arith.constant 0 : index
      %c0_97 = arith.constant 0 : index
      %236 = vector.load %arg20[%c0_96, %c0_97] : memref<1x128xf32, #tpu.memory_space<vmem>>, vector<1x128xf32>
      %237 = arith.addf %235, %236 : vector<1x128xf32>
      %c0_98 = arith.constant 0 : index
      %c0_99 = arith.constant 0 : index
      %c0_100 = arith.constant 0 : index
      %238 = vector.load %arg21[%c0_98, %c0_99, %c0_100] : memref<1x1x128xf32, #tpu.memory_space<vmem>>, vector<1x1x128xf32>
      %239 = vector.shape_cast %238 : vector<1x1x128xf32> to vector<1x128xf32>
      %240 = vector.shape_cast %237 : vector<1x128xf32> to vector<1x1x128xf32>
      tpu.vector_store %arg21[%c0_98, %c0_99, %c0_100], %240 {strides = array<i32>} : memref<1x1x128xf32, #tpu.memory_space<vmem>>, vector<1x1x128xf32>,
    } else {
    }
    return
  }
  func.func @transform_0(%arg0: i32, %arg1: i32) -> (i32, i32, i32) {
    %c0_i32 = arith.constant 0 : i32
    %c0_i32_0 = arith.constant 0 : i32
    %c0_i32_1 = arith.constant 0 : i32
    return %arg0, %c0_i32, %c0_i32_0 : i32, i32, i32
  }
  func.func @transform_1(%arg0: i32, %arg1: i32) -> (i32, i32) {
    %c0_i32 = arith.constant 0 : i32
    %c0_i32_0 = arith.constant 0 : i32
    %c0_i32_1 = arith.constant 0 : i32
    return %c0_i32, %c0_i32_0 : i32, i32
  }
  func.func @transform_2(%arg0: i32, %arg1: i32) -> (i32, i32) {
    %c0_i32 = arith.constant 0 : i32
    %c0_i32_0 = arith.constant 0 : i32
    %c0_i32_1 = arith.constant 0 : i32
    return %c0_i32, %c0_i32_0 : i32, i32
  }
  func.func @transform_3(%arg0: i32, %arg1: i32) -> (i32, i32, i32) {
    %c0_i32 = arith.constant 0 : i32
    %c0_i32_0 = arith.constant 0 : i32
    %c0_i32_1 = arith.constant 0 : i32
    return %arg1, %c0_i32, %c0_i32_0 : i32, i32, i32
  }
  func.func @transform_4(%arg0: i32, %arg1: i32) -> (i32, i32, i32) {
    %c0_i32 = arith.constant 0 : i32
    %c0_i32_0 = arith.constant 0 : i32
    %c0_i32_1 = arith.constant 0 : i32
    return %arg1, %c0_i32, %c0_i32_0 : i32, i32, i32
  }
  func.func @transform_5(%arg0: i32, %arg1: i32) -> (i32, i32, i32) {
    %c0_i32 = arith.constant 0 : i32
    %c0_i32_0 = arith.constant 0 : i32
    %c0_i32_1 = arith.constant 0 : i32
    return %arg1, %c0_i32, %c0_i32_0 : i32, i32, i32
  }
  func.func @transform_6(%arg0: i32, %arg1: i32) -> (i32, i32, i32) {
    %c0_i32 = arith.constant 0 : i32
    %c0_i32_0 = arith.constant 0 : i32
    %c0_i32_1 = arith.constant 0 : i32
    return %arg1, %c0_i32, %c0_i32_0 : i32, i32, i32
  }
  func.func @transform_7(%arg0: i32, %arg1: i32) -> (i32, i32, i32) {
    %c0_i32 = arith.constant 0 : i32
    %c0_i32_0 = arith.constant 0 : i32
    %c0_i32_1 = arith.constant 0 : i32
    return %arg1, %c0_i32, %c0_i32_0 : i32, i32, i32
  }
  func.func @transform_8(%arg0: i32, %arg1: i32) -> (i32, i32, i32) {
    %c0_i32 = arith.constant 0 : i32
    %c0_i32_0 = arith.constant 0 : i32
    %c0_i32_1 = arith.constant 0 : i32
    return %arg1, %c0_i32, %c0_i32_0 : i32, i32, i32
  }
  func.func @transform_9(%arg0: i32, %arg1: i32) -> (i32, i32, i32) {
    %c0_i32 = arith.constant 0 : i32
    %c0_i32_0 = arith.constant 0 : i32
    %c0_i32_1 = arith.constant 0 : i32
    return %arg1, %c0_i32, %c0_i32_0 : i32, i32, i32
  }
  func.func @transform_10(%arg0: i32, %arg1: i32) -> (i32, i32, i32) {
    %c0_i32 = arith.constant 0 : i32
    %c0_i32_0 = arith.constant 0 : i32
    %c0_i32_1 = arith.constant 0 : i32
    return %arg1, %c0_i32, %c0_i32_0 : i32, i32, i32
  }
  func.func @transform_11(%arg0: i32, %arg1: i32) -> (i32, i32, i32) {
    %c0_i32 = arith.constant 0 : i32
    %c0_i32_0 = arith.constant 0 : i32
    %c0_i32_1 = arith.constant 0 : i32
    return %arg1, %c0_i32, %c0_i32_0 : i32, i32, i32
  }
  func.func @transform_12(%arg0: i32, %arg1: i32) -> (i32, i32, i32) {
    %c0_i32 = arith.constant 0 : i32
    %c0_i32_0 = arith.constant 0 : i32
    %c0_i32_1 = arith.constant 0 : i32
    return %arg1, %c0_i32, %c0_i32_0 : i32, i32, i32
  }
  func.func @transform_13(%arg0: i32, %arg1: i32) -> (i32, i32, i32) {
    %c0_i32 = arith.constant 0 : i32
    %c0_i32_0 = arith.constant 0 : i32
    %c0_i32_1 = arith.constant 0 : i32
    return %arg1, %c0_i32, %c0_i32_0 : i32, i32, i32
  }
  func.func @transform_14(%arg0: i32, %arg1: i32) -> (i32, i32, i32) {
    %c0_i32 = arith.constant 0 : i32
    %c0_i32_0 = arith.constant 0 : i32
    %c0_i32_1 = arith.constant 0 : i32
    return %arg1, %c0_i32, %c0_i32_0 : i32, i32, i32
  }
  func.func @transform_15(%arg0: i32, %arg1: i32) -> (i32, i32) {
    %c0_i32 = arith.constant 0 : i32
    %c0_i32_0 = arith.constant 0 : i32
    %c0_i32_1 = arith.constant 0 : i32
    return %c0_i32, %c0_i32_0 : i32, i32
  }
  func.func @transform_16(%arg0: i32, %arg1: i32) -> (i32, i32) {
    %c0_i32 = arith.constant 0 : i32
    %c0_i32_0 = arith.constant 0 : i32
    %c0_i32_1 = arith.constant 0 : i32
    return %c0_i32, %c0_i32_0 : i32, i32
  }
  func.func @transform_17(%arg0: i32, %arg1: i32) -> (i32, i32) {
    %c0_i32 = arith.constant 0 : i32
    %c0_i32_0 = arith.constant 0 : i32
    %c0_i32_1 = arith.constant 0 : i32
    return %c0_i32, %c0_i32_0 : i32, i32
  }
  func.func @transform_18(%arg0: i32, %arg1: i32) -> (i32, i32) {
    %c0_i32 = arith.constant 0 : i32
    %c0_i32_0 = arith.constant 0 : i32
    %c0_i32_1 = arith.constant 0 : i32
    return %c0_i32, %c0_i32_0 : i32, i32
  }
  func.func @transform_19(%arg0: i32, %arg1: i32) -> (i32, i32, i32) {
    %c0_i32 = arith.constant 0 : i32
    %c0_i32_0 = arith.constant 0 : i32
    %c0_i32_1 = arith.constant 0 : i32
    return %arg0, %c0_i32, %c0_i32_0 : i32, i32, i32
  }
}

</mosaic_0001>

<bundles_post_ra>
// kernel: vit_forward.1
= control target key start
LH: loop header
LB: loop body
LE: loop exit
PB: predicated region body
PF: predicated region fallthrough
CT: control target
= control target key end

     0   :  { %s4869_s0 = inlined_call_operand.vmem [shape: f32[2,24,128], index: 0, kind: input, shape index: {}]   ;;  %s4870_s1 = inlined_call_operand.vmem [shape: f32[24,128], index: 1, kind: input, shape index: {}]   ;;  %s4871_s2 = inlined_call_operand.vmem [shape: bf16[128,128], index: 2, kind: input, shape index: {}]   ;;  %s4872_s3 = inlined_call_operand.vmem [shape: f32[2,1,128], index: 3, kind: input, shape index: {}]   ;;  %s4873_s4 = inlined_call_operand.vmem [shape: f32[2,1,128], index: 4, kind: input, shape index: {}]   ;;  %s4874_s5 = inlined_call_operand.vmem [shape: bf16[2,128,384], index: 5, kind: input, shape index: {}]   ;;  %s4875_s6 = inlined_call_operand.vmem [shape: f32[2,1,384], index: 6, kind: input, shape index: {}]   ;;  %s4876_s7 = inlined_call_operand.vmem [shape: bf16[2,128,128], index: 7, kind: input, shape index: {}]   ;;  %s4877_s8 = inlined_call_operand.vmem [shape: f32[2,1,128], index: 8, kind: input, shape index: {}]   ;;  %s4878_s9 = inlined_call_operand.vmem [shape: f32[2,1,128], index: 9, kind: input, shape index: {}]   ;;  %s4879_s10 = inlined_call_operand.vmem [shape: f32[2,1,128], index: 10, kind: input, shape index: {}]   ;;  %s4880_s11 = inlined_call_operand.vmem [shape: bf16[2,128,512], index: 11, kind: input, shape index: {}]   ;;  %s4881_s12 = inlined_call_operand.vmem [shape: f32[2,1,512], index: 12, kind: input, shape index: {}]   ;;  %s4882_s13 = inlined_call_operand.vmem [shape: bf16[2,512,128], index: 13, kind: input, shape index: {}]   ;;  %s4883_s14 = inlined_call_operand.vmem [shape: f32[2,1,128], index: 14, kind: input, shape index: {}]   ;;  %s4884_s15 = inlined_call_operand.vmem [shape: f32[1,128], index: 15, kind: input, shape index: {}]   ;;  %s4885_s16 = inlined_call_operand.vmem [shape: f32[1,128], index: 16, kind: input, shape index: {}]   ;;  %s4886_s17 = inlined_call_operand.vmem [shape: bf16[128,128], index: 17, kind: input, shape index: {}]   ;;  %s4887_s18 = inlined_call_operand.vmem [shape: f32[1,128], index: 18, kind: input, shape index: {}]   ;;  %s4888_s19 = inlined_call_operand.hbm [shape: f32[2,1,128], index: 19, kind: output, shape index: {}]  }
   0x1   :  { %4905 = sst [smem:[#allocation18_spill]] %s4869_s0 }
   0x2   :  { %4906 = sst [smem:[#allocation19_spill]] %s4870_s1 }
   0x3   :  { %4907 = sst [smem:[#allocation20_spill]] %s4871_s2 }
   0x4   :  { %4908 = sst [smem:[#allocation21_spill]] %s4872_s3 }
   0x5   :  { %4909 = sst [smem:[#allocation22_spill]] %s4874_s5 }
   0x6   :  { %4910 = sst [smem:[#allocation23_spill]] %s4875_s6 }
   0x7   :  { %4911 = sst [smem:[#allocation24_spill]] %s4876_s7 }
   0x8   :  { %4912 = sst [smem:[#allocation25_spill]] %s4884_s15 }
   0x9   :  { %4913 = sst [smem:[#allocation26_spill]] %s4885_s16 }
   0xa   :  { %4914 = sst [smem:[#allocation27_spill]] %s4886_s17 }
   0xb   :  { %4915 = sst [smem:[#allocation28_spill]] %s4887_s18 }
   0xc   :  { %4916 = sst [smem:[#allocation29_spill]] %s4888_s19 }
   0xd   :  { %24 = vsyncpa [#allocation4], 0 }
   0xe   :  { %26 = vsyncpa [#allocation4 + $0x1], 0  ;;  %s4100_s0 = smov 0   ;;  %s4102_s30 = smov 0  }
   0xf   :  { %s4104_s20 = smov 0   ;;  %s4106_s21 = smov 0  }
  0x10   :  { %s4108_s1 = smov 0   ;;  %s4110_s22 = smov 0  }
  0x11   :  { %s4112_s2 = smov 0   ;;  %s4114_s23 = smov 0  }
  0x12 LB: > { %4917 = sst [smem:[#allocation6_spill]] %s3965_s0  ;;  %s3108_s24 = sadd.s32 4294967295, %s3993_s23   ;;  %s3993_s23 = sphi %s4114_s23, %s32_s23   ;;  %s3989_s2 = sphi %s4112_s2, %s4967_s2   ;;  %s3985_s22 = sphi %s4110_s22, %s4966_s22   ;;  %s3981_s1 = sphi %s4108_s1, %s4965_s1   ;;  %s3977_s21 = sphi %s4106_s21, %s4964_s21   ;;  %s3973_s20 = sphi %s4104_s20, %s4963_s20   ;;  %s3969_s30 = sphi %s4102_s30, %s4969_s30   ;;  %s3965_s0 = sphi %s4100_s0, %s4968_s0  }
  0x13   : > { %4918 = sst [smem:[#allocation7_spill]] %s3973_s20  ;;  %s3109_s25 = sadd.s32 4294967294, %s3993_s23  }
  0x14   : > { %4919 = sst [smem:[#allocation8_spill]] %s3977_s21  ;;  %s41_s3 = sadd.s32 1, %s3985_s22 }
  0x15   : > { %4920 = sst [smem:[#allocation9_spill]] %s3981_s1  ;;  %p42_p0 = scmp.ge.s32.totalorder %s41_s3, 2 }
  0x16   : > { %4921 = sst [smem:[#allocation10_spill]] %s3985_s22  ;;  %s44_s26 = sadd.s32 1, %s3989_s2 }
  0x17   : > { %4922 = sst [smem:[#allocation11_spill]] %s3989_s2  ;;  %p525_p1 = scmp.ne.s32.totalorder %s3973_s20, %s3969_s30 }
  0x18   : > { %4923 = sst [smem:[#allocation12_spill]] %s3993_s23  ;;  %p526_p2 = scmp.eq.s32.totalorder %s3108_s24, 3 }
  0x19   : > { %s4971_s3 = smov (%p42_p0, %s41_s3), 0  ;;  %s4973_s26 = smov (!%p42_p0, %s44_s26), %s3989_s2 }
  0x1a   : > { %4924 = sst [smem:[#allocation13_spill]] %s4971_s3  ;;  %p4149_p3 = por %p526_p2, %p525_p1 }
  0x1b   : > { %p531_p4 = scmp.ne.s32.totalorder %s3969_s30, %s3965_s0  ;;  %p46_p5 = scmp.ge.s32.totalorder %s4973_s26, 2 }
  0x1c   : > { %s4925_s27 = scalar_select %p4149_p3, 1, 0 }
  0x1d   : > { %p532_p6 = scmp.eq.s32.totalorder %s3109_s25, 3  ;;  %p3112_p7 = scmp.ge.s32.totalorder %s3993_s23, 1 }
  0x1e   : > { %4926 = sst [smem:[#allocation14_spill]] %s4925_s27  ;;  %p658_p8 = scmp.lt.s32.totalorder %s3993_s23, 5 }
  0x1f   : > { %s4975_s26 = smov (%p46_p5, %s4973_s26), 0  ;;  %p4159_p9 = por %p532_p6, %p531_p4 }
  0x20   : > { %4927 = sst [smem:[#allocation15_spill]] %s4975_s26  ;;  %p659_p10 = pnand %p3112_p7, %p658_p8 }
  0x21   : > { %s4928_s28 = scalar_select %p4159_p9, 1, 0 }
  0x22   : > { %s512_s29 = ssub.s32 %s3989_s2, %s4975_s26  ;;  %s515_s24 = sadd.s32 1, %s3973_s20 }
  0x23   : > { %4929 = sst [smem:[#allocation16_spill]] %s4928_s28  ;;  %p513_p11 = scmp.eq.s32.totalorder %s512_s29, 0 }
  0x24   : > { %662 = sbr.rel (%p659_p10) target bundleno = 2992 (0xbb0), region = 96  ;;  %p759_p12 = scmp.lt.s32.totalorder (!%p659_p10), %s3981_s1, 1 }
  0x25   : > { %s4167_s3 = scalar_select %p513_p11, %s3973_s20, %s515_s24  }
  0x26   : > { %p764_p13 = scmp.lt.s32.totalorder (!%p659_p10), %s3977_s21, 1  ;;  %s4932_s19 = sld [smem:[#allocation18_spill]] (!%p659_p10) }
  0x27   : > { %4930 = sst [smem:[#allocation17_spill]] %s4167_s3 }
  0x28   : > { %s4933_s5 = sld [smem:[#allocation22_spill]] (!%p659_p10) }
  0x29   : > { %s760_s22 = scalar_select %p759_p12, %s3981_s1, 1 }
  0x2a   : > { %s4174_s0 = scalar_select %p764_p13, %s3977_s21, 1 }
  0x2b   : > { %s3723_s29 = smul.u32 24, %s760_s22  ;;  %s4934_s7 = sld [smem:[#allocation24_spill]] }
  0x2c   : > { %s3724_s18 = smul.u32 192, %s4174_s0  ;;  %s3598_s15 = sshll.u32 %s4174_s0, 6 }
  0x2d   : > { %s4187_s1 = scalar_lea.vmem %s4932_s19, %s3723_s29  ;;  %s3725_s16 = smul.u32 3, %s4174_s0 }
  0x2e   : > { %s4195_s21 = scalar_lea.vmem %s4933_s5, %s3724_s18  ;;  %s4935_s6 = sld [smem:[#allocation23_spill]] }
  0x2f   : > { %s3599_s2 = sshll.u32 %s4174_s0, 8  ;;  %s809_s22 = scalar_lea.vmem %s4883_s14, %s4174_s0 }
  0x30   : > { %s4224_s3 = scalar_lea.vmem %s4880_s11, %s3599_s2  ;;  %s4234_s28 = scalar_lea.vmem %s4882_s13, %s3599_s2 }
  0x31   : > { %s4200_s20 = scalar_lea.vmem %s4934_s7, %s3598_s15  ;;  %s3119_s15 = sshll.u32 %s4174_s0, 2 }
  0x32   : > { %s4229_s19 = scalar_lea.vmem %s4881_s12, %s3119_s15  ;;  %s4936_s5 = sand.u32 1, %s3969_s30  }
  0x33   : > { %s4242_s17 = scalar_lea.vmem [#allocation3], %s4936_s5  ;;  %s4937_s7 = sld [smem:[#allocation8_spill]] }
  0x34   : > { %s4205_s23 = scalar_lea.vmem %s4935_s6, %s3725_s16 }
  0x39   : > { %p3122_p0 = scmp.ne.s32.totalorder %s4937_s7, 0 }
  0x3a   : > { %s4938_s16 = sld [smem:[#allocation20_spill]] (!%p3122_p0) }
  0x3b   : > { %814 = sbr.rel (%p3122_p0) target bundleno = 233 (0xe9), region = 100  ;;  %s4939_s27 = sld [smem:[#allocation19_spill]] (!%p3122_p0) }
  0x40   : > { %v3608_v0 = vld [vmem:[%s4938_s16 + $0x38] sm:$0xff]  ;;  %v3607_v1 = vld [vmem:[%s4938_s16 + $0x30] sm:$0xff]  ;;  %v3606_v2 = vld [vmem:[%s4938_s16 + $0x28] sm:$0xff] }
  0x41   : > { %887 = vmatpush.bf16.msra.mxu0 %v3608_v0  ;;  %3713 = vmatpush.bf16.msra.mxu1 %v3608_v0  ;;  %v3605_v3 = vld [vmem:[%s4938_s16 + $0x20] sm:$0xff]  ;;  %v3604_v4 = vld [vmem:[%s4938_s16 + $0x18] sm:$0xff]  ;;  %v3603_v5 = vld [vmem:[%s4938_s16 + $0x10] sm:$0xff] }
  0x42   : > { %v3602_v6 = vld [vmem:[%s4938_s16 + $0x8] sm:$0xff]  ;;  %v3601_v7 = vld [vmem:[%s4938_s16] sm:$0xff]  ;;  %v817_v10 = vld [vmem:[%s4187_s1 + $0x10] sm:$0xff] }
  0x43   : > { %v815_v8 = vld [vmem:[%s4187_s1] sm:$0xff]  ;;  %v816_v9 = vld [vmem:[%s4187_s1 + $0x8] sm:$0xff]  ;;  %v819_v12 = vpack.c.bf16 %v817_v10, %v817_v10  ;;  %v838_v14 = vld [vmem:[%s4939_s27 + $0x10] sm:$0xff] }
  0x44   : > { %v818_v11 = vpack.c.bf16 %v816_v9, %v815_v8  ;;  %v836_v13 = vld [vmem:[%s4939_s27] sm:$0xff]  ;;  %v837_v19 = vld [vmem:[%s4939_s27 + $0x8] sm:$0xff] }
  0x45   : > { %888 = vmatpush.bf16.msra.mxu0 %v3607_v1  ;;  %3714 = vmatpush.bf16.msra.mxu1 %v3607_v1 }
  0x49   : > { %889 = vmatpush.bf16.msra.mxu0 %v3606_v2  ;;  %3715 = vmatpush.bf16.msra.mxu1 %v3606_v2 }
  0x4d   : > { %890 = vmatpush.bf16.msra.mxu0 %v3605_v3  ;;  %3716 = vmatpush.bf16.msra.mxu1 %v3605_v3 }
  0x51   : > { %891 = vmatpush.bf16.msra.mxu0 %v3604_v4  ;;  %3717 = vmatpush.bf16.msra.mxu1 %v3604_v4 }
  0x55   : > { %892 = vmatpush.bf16.msra.mxu0 %v3603_v5  ;;  %3718 = vmatpush.bf16.msra.mxu1 %v3603_v5 }
  0x59   : > { %893 = vmatpush.bf16.msra.mxu0 %v3602_v6  ;;  %3719 = vmatpush.bf16.msra.mxu1 %v3602_v6 }
  0x5d   : > { %894 = vmatpush.bf16.msra.mxu0 %v3601_v7  ;;  %3720 = vmatpush.bf16.msra.mxu1 %v3601_v7 }
  0x60   : > { %895 = vmatmul.bf16.vlgmr.msra.gmra.mxu0 %v818_v11  ;;  %900 = vmatmul.bf16.vlgmr.msra.gmra.mxu1 %v819_v12 }
  0xdd   : > { %v896_v15 = vpop.f32.mrf.mxu0  ;;  %v901_v16 = vpop.f32.mrf.mxu1 }
  0xde   : > { %v897_v17 = vadd.f32 %v896_v15, %v836_v13  ;;  %v902_v18 = vadd.f32 %v901_v16, %v838_v14 }
  0xe0   : > { %905 = vst [vmem:[#allocation2 + $0x10] sm:$0xff] %v897_v17 }
  0xe1   : > { %907 = vst [vmem:[#allocation2 + $0x8] sm:$0xff] %v902_v18 }
  0xe5   : > { %v898_v20 = vpop.f32.mrf.mxu0  ;;  %v903_v21 = vpop.f32.mrf.mxu1 }
  0xe6   : > { %v899_v22 = vadd.f32 %v898_v20, %v837_v19 }
  0xe8   : > { %906 = vst [vmem:[#allocation2] sm:$0xff] %v899_v22 }
  0xe9 PF: > { %v908_v23 = vld [vmem:[#allocation2 + $0x10] sm:$0xff]  ;;  %v910_v24 = vld [vmem:[#allocation2 + $0x8] sm:$0xff]  ;;  %v3995_v26 = vmov 128.0   ;;  %v3243_v49 = vld [vmem:[%s4195_s21 + $0xb4] sm:$0xf0]  ;;  %s4940_s26 = sld [smem:[#allocation21_spill]]  ;;  %s4942_s24 = scalar_lea.vmem %s4873_s4, %s4174_s0 }
  0xea   : > { %913 = vadd.xlane.f32.xlu0 %v908_v23  ;;  %917 = vadd.xlane.f32.xlu1 %v910_v24  ;;  %3808 = vrcp.f32 %v3995_v26  ;;  %v3241_v45 = vld [vmem:[%s4195_s21 + $0xa8] sm:$0xf]  ;;  %v3631_v46 = vld [vmem:[%s4195_s21 + $0xb0] sm:$0xf0]  ;;  %v3630_v47 = vld [vmem:[%s4195_s21 + $0xac] sm:$0xf]  ;;  %s4945_s1 = scalar_lea.vmem %s4877_s8, %s4174_s0 }
  0xeb   : > { %v3242_v48 = vor.u32 %v3631_v46, %v3241_v45  ;;  %v3249_v50 = vld [vmem:[%s4195_s21 + $0xb0] sm:$0xf]  ;;  %v3632_v51 = vld [vmem:[%s4195_s21 + $0xb8] sm:$0xf0]  ;;  %v3246_v52 = vor.u32 %v3630_v47, %v3243_v49  ;;  %v3627_v56 = vld [vmem:[%s4195_s21 + $0x94] sm:$0xf] }
  0xec   : > { %v3250_v53 = vor.u32 %v3632_v51, %v3249_v50  ;;  %v3229_v54 = vld [vmem:[%s4195_s21 + $0x90] sm:$0xf]  ;;  %v3628_v55 = vld [vmem:[%s4195_s21 + $0x98] sm:$0xf0]  ;;  %v3231_v58 = vld [vmem:[%s4195_s21 + $0x9c] sm:$0xf0] }
  0xed   : > { %1162 = vmatpush.bf16.msra.mxu0 %v3242_v48  ;;  %1180 = vmatpush.bf16.msra.mxu1 %v3246_v52  ;;  %v3230_v57 = vor.u32 %v3628_v55, %v3229_v54  ;;  %v3237_v59 = vld [vmem:[%s4195_s21 + $0x98] sm:$0xf]  ;;  %v3629_v60 = vld [vmem:[%s4195_s21 + $0xa0] sm:$0xf0]  ;;  %v3234_v61 = vor.u32 %v3627_v56, %v3231_v58  ;;  %v3624_v1 = vld [vmem:[%s4195_s21 + $0x7c] sm:$0xf] }
  0xee   : > { %1198 = vmatpush.bf16.msra.mxu2 %v3250_v53  ;;  %v3238_v62 = vor.u32 %v3629_v60, %v3237_v59  ;;  %v3217_v63 = vld [vmem:[%s4195_s21 + $0x78] sm:$0xf]  ;;  %v3625_v0 = vld [vmem:[%s4195_s21 + $0x80] sm:$0xf0]  ;;  %v3219_v3 = vld [vmem:[%s4195_s21 + $0x84] sm:$0xf0] }
  0xef   : > { %v909_v25 = vld [vmem:[#allocation2] sm:$0xff]  ;;  %v3218_v2 = vor.u32 %v3625_v0, %v3217_v63  ;;  %v3626_v5 = vld [vmem:[%s4195_s21 + $0x88] sm:$0xf0]  ;;  %v3222_v6 = vor.u32 %v3624_v1, %v3219_v3  ;;  %v3207_v12 = vld [vmem:[%s4195_s21 + $0x6c] sm:$0xf0]  ;;  %s4941_s15 = scalar_lea.vmem %s4940_s26, %s4174_s0  ;;  %vm1245_vm10 = vcmask 261120  }
  0xf0   : > { %v3809_v27 = vpop.eup %3808  ;;  %v3225_v4 = vld [vmem:[%s4195_s21 + $0x80] sm:$0xf]  ;;  %v3622_v9 = vld [vmem:[%s4195_s21 + $0x68] sm:$0xf0]  ;;  %v3621_v10 = vld [vmem:[%s4195_s21 + $0x64] sm:$0xf] }
  0xf1   : > { %v920_v28 = vmul.f32 128.0, %v3809_v27  ;;  %vm924_vm0 = vweird.f32 %v3809_v27  ;;  %1163 = vmatpush.bf16.msra.mxu0 %v3230_v57  ;;  %1181 = vmatpush.bf16.msra.mxu1 %v3234_v61  ;;  %v3226_v7 = vor.u32 %v3626_v5, %v3225_v4  ;;  %v3205_v8 = vld [vmem:[%s4195_s21 + $0x60] sm:$0xf]  ;;  %v3213_v13 = vld [vmem:[%s4195_s21 + $0x68] sm:$0xf]  ;;  %v3210_v15 = vor.u32 %v3621_v10, %v3207_v12  ;;  %s3998_s5 = smov 64  }
  0xf2   : > { %915 = vadd.xlane.f32.xlu0 %v909_v25  ;;  %1199 = vmatpush.bf16.msra.mxu2 %v3238_v62  ;;  %v3206_v11 = vor.u32 %v3622_v9, %v3205_v8  ;;  %v3623_v14 = vld [vmem:[%s4195_s21 + $0x70] sm:$0xf0]  ;;  %v3193_v17 = vld [vmem:[%s4195_s21 + $0x48] sm:$0xf]  ;;  %v3618_v19 = vld [vmem:[%s4195_s21 + $0x4c] sm:$0xf] }
  0xf3   : > { %v921_v29 = vsub.f32 1.0, %v920_v28  ;;  %v3214_v16 = vor.u32 %v3623_v14, %v3213_v13  ;;  %v3619_v18 = vld [vmem:[%s4195_s21 + $0x50] sm:$0xf0]  ;;  %v3195_v21 = vld [vmem:[%s4195_s21 + $0x54] sm:$0xf0]  ;;  %vm1357_vm11 = vcmask 1043456  }
  0xf4   : > { %v3194_v20 = vor.u32 %v3619_v18, %v3193_v17  ;;  %v3201_v22 = vld [vmem:[%s4195_s21 + $0x50] sm:$0xf]  ;;  %v3615_v28 = vld [vmem:[%s4195_s21 + $0x34] sm:$0xf]  ;;  %v3614_v45 = vld [vmem:[%s4195_s21 + $0x28] sm:$0xf0] }
  0xf5   : > { %v922_v30 = vmul.f32 %v3809_v27, %v921_v29  ;;  %1164 = vmatpush.bf16.msra.mxu0 %v3218_v2  ;;  %1182 = vmatpush.bf16.msra.mxu1 %v3222_v6  ;;  %v3181_v26 = vld [vmem:[%s4195_s21 + $0x30] sm:$0xf]  ;;  %v3157_v50 = vld [vmem:[%s4195_s21] sm:$0xf]  ;;  %v3610_v51 = vld [vmem:[%s4195_s21 + $0x8] sm:$0xf0] }
  0xf6   : > { %1200 = vmatpush.bf16.msra.mxu2 %v3226_v7  ;;  %v3609_v52 = vld [vmem:[%s4195_s21 + $0x4] sm:$0xf]  ;;  %v3158_v53 = vor.u32 %v3610_v51, %v3157_v50  ;;  %v3159_v54 = vld [vmem:[%s4195_s21 + $0xc] sm:$0xf0]  ;;  %v3165_v55 = vld [vmem:[%s4195_s21 + $0x8] sm:$0xf] }
  0xf7   : > { %v923_v31 = vadd.f32 %v3809_v27, %v922_v30  ;;  %v3183_v30 = vld [vmem:[%s4195_s21 + $0x3c] sm:$0xf0]  ;;  %v3611_v56 = vld [vmem:[%s4195_s21 + $0x10] sm:$0xf0]  ;;  %v3162_v58 = vor.u32 %v3609_v52, %v3159_v54  ;;  %vm1276_vm13 = vcmask 195584   ;;  %s3999_s6 = smov 32  }
  0xf8   : > { %v3166_v59 = vor.u32 %v3611_v56, %v3165_v55 }
  0xf9   : > { %v4281_v32 = vsel %vm924_vm0, %v3809_v27, %v923_v31  ;;  %1165 = vmatpush.bf16.msra.mxu0 %v3206_v11  ;;  %1183 = vmatpush.bf16.msra.mxu1 %v3210_v15  ;;  %v3616_v27 = vld [vmem:[%s4195_s21 + $0x38] sm:$0xf0]  ;;  %v3189_v31 = vld [vmem:[%s4195_s21 + $0x38] sm:$0xf] }
  0xfa   : > { %1201 = vmatpush.bf16.msra.mxu2 %v3214_v16  ;;  %v3182_v29 = vor.u32 %v3616_v27, %v3181_v26  ;;  %v3802_v16 = vld [vmem:[%s4941_s15] ss:$0 sm:$0xff]  ;;  %s4947_s15 = scalar_lea.vmem %s4879_s10, %s4174_s0 }
  0xfd   : > { %1166 = vmatpush.bf16.msra.mxu0 %v3194_v20 }
 0x101   : > { %1167 = vmatpush.bf16.msra.mxu0 %v3182_v29 }
 0x15d   : > { %v914_v33 = vpop.xlane.xlu0 %913  ;;  %v918_v38 = vpop.xlane.xlu1 %917 }
 0x15e   : > { %v926_v34 = vmul.f32 %v4281_v32, %v914_v33  ;;  %v928_v41 = vmul.f32 %v4281_v32, %v918_v38  ;;  %v3617_v33 = vld [vmem:[%s4195_s21 + $0x40] sm:$0xf0] }
 0x15f   : > { %v3613_v38 = vld [vmem:[%s4195_s21 + $0x20] sm:$0xf0] }
 0x160   : > { %v4284_v35 = vsub.f32 %v908_v23, %v926_v34  ;;  %v4294_v43 = vsub.f32 %v910_v24, %v928_v41  ;;  %v3620_v23 = vld [vmem:[%s4195_s21 + $0x58] sm:$0xf0]  ;;  %v3198_v24 = vor.u32 %v3618_v19, %v3195_v21  ;;  %v3186_v34 = vor.u32 %v3615_v28, %v3183_v30 }
 0x162   : > { %v932_v36 = vmul.f32 %v4284_v35, %v4284_v35  ;;  %v934_v44 = vmul.f32 %v4294_v43, %v4294_v43  ;;  %1184 = vmatpush.bf16.msra.mxu1 %v3198_v24 }
 0x164   : > { %935 = vadd.xlane.f32.xlu1 %v932_v36  ;;  %v3190_v36 = vor.u32 %v3617_v33, %v3189_v31 }
 0x165   : > { %v916_v37 = vpop.xlane.xlu0 %915 }
 0x166   : > { %v927_v39 = vmul.f32 %v4281_v32, %v916_v37  ;;  %1185 = vmatpush.bf16.msra.mxu1 %v3186_v34  ;;  %v3169_v37 = vld [vmem:[%s4195_s21 + $0x18] sm:$0xf] }
 0x167   : > { %v3170_v41 = vor.u32 %v3613_v38, %v3169_v37 }
 0x168   : > { %v4289_v40 = vsub.f32 %v909_v25, %v927_v39  ;;  %v3202_v25 = vor.u32 %v3620_v23, %v3201_v22  ;;  %v3612_v39 = vld [vmem:[%s4195_s21 + $0x1c] sm:$0xf]  ;;  %v3803_v23 = vld [vmem:[%s4942_s24] ss:$0 sm:$0xff] }
 0x169   : > { %1168 = vmatpush.bf16.msra.mxu0 %v3170_v41 }
 0x16a   : > { %v933_v42 = vmul.f32 %v4289_v40, %v4289_v40  ;;  %1202 = vmatpush.bf16.msra.mxu2 %v3202_v25 }
 0x16c   : > { %937 = vadd.xlane.f32.xlu2 %v933_v42  ;;  %v3171_v42 = vld [vmem:[%s4195_s21 + $0x24] sm:$0xf0] }
 0x16d   : > { %v3174_v46 = vor.u32 %v3612_v39, %v3171_v42  ;;  %1169 = vmatpush.bf16.msra.mxu0 %v3158_v53  ;;  %v1026_v42 = vld [vmem:[%s4205_s23] sm:$0x7]  ;;  %s3997_s23 = smov 96  }
 0x16e   : > { %1203 = vmatpush.bf16.msra.mxu2 %v3190_v36  ;;  %v1030_v51 = vperm.slane %v1026_v42, 2 }
 0x16f   : > { %1186 = vmatpush.bf16.msra.mxu1 %v3174_v46 }
 0x173   : > { %1187 = vmatpush.bf16.msra.mxu1 %v3162_v58 }
 0x174   : > { %939 = vadd.xlane.f32.xlu2 %v934_v44  ;;  %v3177_v44 = vld [vmem:[%s4195_s21 + $0x20] sm:$0xf]  ;;  %s4946_s21 = scalar_lea.vmem %s4878_s9, %s4174_s0  ;;  %s4948_s0 = sld [smem:[#allocation8_spill]] }
 0x175   : > { %v3178_v47 = vor.u32 %v3614_v45, %v3177_v44  ;;  %v1029_v44 = vperm.slane %v1026_v42, 1 }
 0x177   : > { %1204 = vmatpush.bf16.msra.mxu2 %v3178_v47 }
 0x17a   : > { %p3563_p1 = scmp.ne.s32.totalorder %s4948_s0, 1 }
 0x17b   : > { %1205 = vmatpush.bf16.msra.mxu2 %v3166_v59  ;;  %s4949_s2 = sld [smem:[#allocation27_spill]] (!%p3563_p1) }
 0x17c   : > { %s4951_s29 = sld [smem:[#allocation25_spill]] (!%p3563_p1) }
 0x17d   : > { %s4953_s25 = sld [smem:[#allocation28_spill]] (!%p3563_p1) }
 0x181   : > { %s4950_s24 = smov (!%p3563_p1), %s4949_s2 }
 0x1d7   : > { %v936_v48 = vpop.xlane.xlu1 %935 }
 0x1d8   : > { %v941_v49 = vmul.f32 %v936_v48, %v4281_v32 }
 0x1da   : > { %v944_v57 = vadd.f32 1e-05, %v941_v49 }
 0x1dc   : > { %3810 = vrsqrt.f32 %v944_v57  ;;  %vm953_vm2 = vweird.f32 %v944_v57 }
 0x1df   : > { %v938_v60 = vpop.xlane.xlu2 %937 }
 0x1e0   : > { %v942_v61 = vmul.f32 %v938_v60, %v4281_v32 }
 0x1e2   : > { %v3811_v62 = vpop.eup %3810  ;;  %v945_v63 = vadd.f32 1e-05, %v942_v61 }
 0x1e3   : > { %v948_v0 = vmul.f32 %v3811_v62, %v944_v57  ;;  %vm954_vm1 = vweird.f32 %v3811_v62  ;;  %v1028_v57 = vperm.slane %v1026_v42, 0 }
 0x1e4   : > { %3812 = vrsqrt.f32 %v945_v63  ;;  %vm955_vm3 = vmor %vm953_vm2, %vm954_vm1  ;;  %vm963_vm5 = vweird.f32 %v945_v63 }
 0x1e5   : > { %v949_v1 = vmul.f32 %v3811_v62, %v948_v0 }
 0x1e7   : > { %v950_v2 = vmul.f32 0.5, %v949_v1  ;;  %v940_v3 = vpop.xlane.xlu2 %939 }
 0x1e8   : > { %v943_v4 = vmul.f32 %v940_v3, %v4281_v32 }
 0x1e9   : > { %v951_v5 = vsub.f32 1.5, %v950_v2 }
 0x1ea   : > { %v3813_v6 = vpop.eup %3812  ;;  %v946_v7 = vadd.f32 1e-05, %v943_v4 }
 0x1eb   : > { %v952_v8 = vmul.f32 %v3811_v62, %v951_v5  ;;  %v958_v9 = vmul.f32 %v3813_v6, %v945_v63  ;;  %vm964_vm4 = vweird.f32 %v3813_v6 }
 0x1ec   : > { %3814 = vrsqrt.f32 %v946_v7  ;;  %vm965_vm6 = vmor %vm963_vm5, %vm964_vm4  ;;  %vm973_vm7 = vweird.f32 %v946_v7 }
 0x1ed   : > { %v959_v10 = vmul.f32 %v3813_v6, %v958_v9  ;;  %v956_v11 = vsel %vm955_vm3, %v3811_v62, %v952_v8 }
 0x1ee   : > { %v977_v15 = vmul.f32 %v956_v11, %v4284_v35 }
 0x1ef   : > { %v960_v12 = vmul.f32 0.5, %v959_v10  ;;  %v1216_v10 = vlaneseq }
 0x1f0   : > { %v983_v22 = vmul.f32 %v3802_v16, %v977_v15 }
 0x1f1   : > { %v961_v13 = vsub.f32 1.5, %v960_v12  ;;  %v1217_v11 = vand.u32 127, %v1216_v10  ;;  %v3996_v12 = vmov -1e+30  }
 0x1f2   : > { %v3815_v14 = vpop.eup %3814  ;;  %v989_v26 = vadd.f32 %v3803_v23, %v983_v22 }
 0x1f3   : > { %v962_v17 = vmul.f32 %v3813_v6, %v961_v13  ;;  %v968_v18 = vmul.f32 %v3815_v14, %v946_v7  ;;  %vm974_vm8 = vweird.f32 %v3815_v14  ;;  %vm1218_vm12 = vcmp.lt.s32.totalorder %v1217_v11, 17 }
 0x1f4   : > { %vm975_vm9 = vmor %vm973_vm7, %vm974_vm8  ;;  %v4380_v13 = vsel %vm1218_vm12, 0.0, %v3996_v12 }
 0x1f5   : > { %v966_v19 = vsel %vm965_vm6, %v3813_v6, %v962_v17  ;;  %v969_v20 = vmul.f32 %v3815_v14, %v968_v18 }
 0x1f6   : > { %v978_v21 = vmul.f32 %v966_v19, %v4289_v40 }
 0x1f7   : > { %v970_v35 = vmul.f32 0.5, %v969_v20 }
 0x1f8   : > { %v984_v24 = vmul.f32 %v3802_v16, %v978_v21 }
 0x1f9   : > { %v971_v25 = vsub.f32 1.5, %v970_v35 }
 0x1fa   : > { %v990_v27 = vadd.f32 %v3803_v23, %v984_v24 }
 0x1fb   : > { %v972_v28 = vmul.f32 %v3815_v14, %v971_v25 }
 0x1fc   : > { %v992_v29 = vpack.c.bf16 %v990_v27, %v989_v26 }
 0x1fd   : > { %v976_v30 = vsel %vm975_vm9, %v3815_v14, %v972_v28 }
 0x1fe   : > { %1170 = vmatmul.bf16.vlgmr.msra.gmra.mxu0 %v992_v29  ;;  %1188 = vmatmul.bf16.vlgmr.msra.gmra.mxu1 %v992_v29  ;;  %v979_v40 = vmul.f32 %v976_v30, %v4294_v43 }
 0x1ff   : > { %1206 = vmatmul.bf16.vlgmr.msra.gmra.mxu2 %v992_v29 }
 0x200   : > { %v985_v31 = vmul.f32 %v3802_v16, %v979_v40 }
 0x202   : > { %v991_v33 = vadd.f32 %v3803_v23, %v985_v31 }
 0x204   : > { %v993_v34 = vpack.c.bf16 %v991_v33, %v991_v33 }
 0x20e   : > { %1175 = vmatmul.bf16.gmra.mxu0 %v993_v34  ;;  %1193 = vmatmul.bf16.gmra.mxu1 %v993_v34 }
 0x20f   : > { %1211 = vmatmul.bf16.gmra.mxu2 %v993_v34 }
 0x27b   : > { %v1171_v36 = vpop.f32.mrf.mxu0  ;;  %v1189_v37 = vpop.f32.mrf.mxu1 }
 0x27c   : > { %v1190_v52 = vadd.f32 %v1189_v37, %v1029_v44  ;;  %v1172_v61 = vadd.f32 %v1171_v36, %v1028_v57 }
 0x27e   : > { %v1236_v4 = vmul.f32 0.17677669, %v1172_v61 }
 0x282   : > { %v1207_v38 = vpop.f32.mrf.mxu2 }
 0x283   : > { %v1173_v39 = vpop.f32.mrf.mxu0  ;;  %v1191_v41 = vpop.f32.mrf.mxu1  ;;  %v1208_v1 = vadd.f32 %v1207_v38, %v1030_v51 }
 0x284   : > { %v1192_v43 = vadd.f32 %v1191_v41, %v1029_v44  ;;  %v1174_v60 = vadd.f32 %v1173_v39, %v1028_v57  ;;  %v3634_v41 = vld [vmem:[%s4200_s20 + $0x8] sm:$0xff] }
 0x286   : > { %v4367_v58 = vpack.c.bf16 %v1192_v43, %v1190_v52  ;;  %v1237_v2 = vmul.f32 0.17677669, %v1174_v60 }
 0x288   : > { %v1253_v63 = vsel %vm1245_vm10, %v4367_v58, 0  ;;  %v1239_v6 = vpack.c.bf16 %v1237_v2, %v1236_v4 }
 0x28a   : > { %v1209_v45 = vpop.f32.mrf.mxu2 }
 0x28b   : > { %v1176_v46 = vpop.f32.mrf.mxu0  ;;  %v1194_v47 = vpop.f32.mrf.mxu1  ;;  %v1210_v62 = vadd.f32 %v1209_v45, %v1030_v51 }
 0x28c   : > { %v1195_v48 = vadd.f32 %v1194_v47, %v1029_v44  ;;  %v1177_v7 = vadd.f32 %v1176_v46, %v1028_v57  ;;  %v3633_v46 = vld [vmem:[%s4200_s20] sm:$0xff] }
 0x28d   : > { %v4375_v5 = vpack.c.bf16 %v1210_v62, %v1208_v1 }
 0x28e   : > { %v4363_v49 = vpack.c.bf16 %v1195_v48, %v1195_v48  ;;  %v1238_v8 = vmul.f32 0.17677669, %v1177_v7 }
 0x290   : > { %v1256_v50 = vsel %vm1245_vm10, %v4363_v49, 0  ;;  %v1240_v9 = vpack.c.bf16 %v1238_v8, %v1238_v8 }
 0x291   : > { %1264 = vmatpush.bf16.xpose.msra.mxu3 %v1256_v50 }
 0x292   : > { %v1212_v53 = vpop.f32.mrf.mxu2 }
 0x293   : > { %v1213_v54 = vadd.f32 %v1212_v53, %v1030_v51  ;;  %v1178_v55 = vpop.f32.mrf.mxu0  ;;  %v1196_v56 = vpop.f32.mrf.mxu1 }
 0x295   : > { %v4369_v59 = vpack.c.bf16 %v1213_v54, %v1213_v54 }
 0x297   : > { %v1359_v0 = vsel %vm1357_vm11, %v4369_v59, 0 }
 0x299   : > { %1265 = vmatpush.bf16.xpose.msra.mxu3 %v1253_v63 }
 0x29a   : > { %v1214_v3 = vpop.f32.mrf.mxu2 }
 0x2a0   : > { %3251 = vmatmul.msk.bf16.vlgmr.msra.gmra.mxu3 %vm1245_vm10, %v1239_v6 }
 0x2a1   : > { %1367 = vmatpush.bf16.msrb.mxu3 %v1359_v0 }
 0x2a5   : > { %1368 = vmatpush.bf16.msrb.mxu3 %v4375_v5 }
 0x2a9   : > { %1593 = vmatpush.bf16.msra.mxu3 %v3634_v41 }
 0x2ad   : > { %1594 = vmatpush.bf16.msra.mxu3 %v3633_v46 }
 0x2b0   : > { %3252 = vmatmul.msk.bf16.gmra.mxu3 %vm1245_vm10, %v1240_v9 }
 0x323   : > { %v1267_v14 = vpop.f32.mrf.mxu3 }
 0x324   : > { %v1268_v15 = vadd.f32 %v1267_v14, %v4380_v13 }
 0x326   : > { %v1277_v16 = vsel %vm1276_vm13, %v1268_v15, -inf }
 0x327   : > { %1278 = vmax.xlane.f32.xlu0 %v1277_v16 }
 0x32b   : > { %v1269_v17 = vpop.f32.mrf.mxu3 }
 0x32c   : > { %v1270_v18 = vadd.f32 %v1269_v17, %v4380_v13 }
 0x32e   : > { %v1280_v19 = vsel %vm1276_vm13, %v1270_v18, -inf }
 0x32f   : > { %1281 = vmax.xlane.f32.xlu1 %v1280_v19 }
 0x333   : > { %v1272_v20 = vpop.f32.mrf.mxu3 }
 0x334   : > { %v1273_v21 = vadd.f32 %v1272_v20, %v4380_v13 }
 0x336   : > { %v1283_v22 = vsel %vm1276_vm13, %v1273_v21, -inf }
 0x337   : > { %1284 = vmax.xlane.f32.xlu2 %v1283_v22 }
 0x33b   : > { %v1274_v23 = vpop.f32.mrf.mxu3 }
 0x39a   : > { %v1279_v35 = vpop.xlane.xlu0 %1278 }
 0x39b   : > { %v1286_v24 = vsub.f32 %v1268_v15, %v1279_v35 }
 0x39d   : > { %v1289_v25 = vmul.f32 1.442695, %v1286_v24 }
 0x39f   : > { %3816 = vpow2.f32 %v1289_v25 }
 0x3a2   : > { %v1282_v26 = vpop.xlane.xlu1 %1281 }
 0x3a3   : > { %v1287_v27 = vsub.f32 %v1270_v18, %v1282_v26 }
 0x3a5   : > { %v4388_v28 = vpop.eup %3816  ;;  %v1291_v29 = vmul.f32 1.442695, %v1287_v27 }
 0x3a6   : > { %v1295_v30 = vsel %vm1276_vm13, %v4388_v28, 0.0 }
 0x3a7   : > { %3818 = vpow2.f32 %v1291_v29  ;;  %1296 = vadd.xlane.f32.xlu0 %v1295_v30 }
 0x3aa   : > { %v1285_v40 = vpop.xlane.xlu2 %1284 }
 0x3ab   : > { %v1288_v31 = vsub.f32 %v1273_v21, %v1285_v40 }
 0x3ad   : > { %v4392_v33 = vpop.eup %3818  ;;  %v1293_v34 = vmul.f32 1.442695, %v1288_v31 }
 0x3ae   : > { %v1298_v36 = vsel %vm1276_vm13, %v4392_v33, 0.0 }
 0x3af   : > { %3820 = vpow2.f32 %v1293_v34  ;;  %1299 = vadd.xlane.f32.xlu1 %v1298_v36 }
 0x3b5   : > { %v4396_v37 = vpop.eup %3820 }
 0x3b6   : > { %v1301_v38 = vsel %vm1276_vm13, %v4396_v37, 0.0 }
 0x3b7   : > { %1302 = vadd.xlane.f32.xlu2 %v1301_v38 }
 0x3bb   : > { %1391 = vrot.lane.b32.xlu0 %v4363_v49, %s3997_s23 }
 0x3c3   : > { %1611 = vrot.lane.b32.xlu0 %v4363_v49, %s3998_s5 }
 0x3c8   : > { %1389 = vrot.lane.b32.xlu1 %v4367_v58, %s3997_s23 }
 0x3cb   : > { %1609 = vrot.lane.b32.xlu0 %v4367_v58, %s3998_s5 }
 0x3cf   : > { %1383 = vrot.lane.b32.xlu2 %v1239_v6, %s3997_s23 }
 0x3d0   : > { %1796 = vrot.lane.b32.xlu1 %v4363_v49, %s3999_s6 }
 0x3d3   : > { %1790 = vrot.lane.b32.xlu0 %v1239_v6, %s3999_s6 }
 0x3d7   : > { %1385 = vrot.lane.b32.xlu2 %v1240_v9, %s3997_s23 }
 0x3d8   : > { %1605 = vrot.lane.b32.xlu1 %v1239_v6, %s3998_s5 }
 0x3df   : > { %1794 = vrot.lane.b32.xlu2 %v4367_v58, %s3999_s6 }
 0x3e0   : > { %1792 = vrot.lane.b32.xlu1 %v1240_v9, %s3999_s6 }
 0x3e7   : > { %1607 = vrot.lane.b32.xlu2 %v1240_v9, %s3998_s5 }
 0x41a   : > { %v1297_v39 = vpop.xlane.xlu0 %1296 }
 0x41b   : > { %3822 = vrcp.f32 %v1297_v39  ;;  %v1315_v52 = vand.u32 2147483648, %v1297_v39  ;;  %vm1309_vm15 = vweird.f32 %v1297_v39  ;;  %v1313_v53 = vand.u32 2147483647, %v1297_v39 }
 0x41d   : > { %v1316_v63 = vor.u32 1.1754944e-38, %v1315_v52  ;;  %vm1314_vm2 = vcmp.eq.f32.partialorder %v1313_v53, 8.507059e+37 }
 0x421   : > { %v3823_v42 = vpop.eup %3822 }
 0x422   : > { %v1305_v44 = vmul.f32 %v3823_v42, %v1297_v39  ;;  %v1300_v45 = vpop.xlane.xlu1 %1299  ;;  %vm1310_vm14 = vweird.f32 %v3823_v42 }
 0x423   : > { %3824 = vrcp.f32 %v1300_v45  ;;  %vm4420_vm0 = vmor %vm1309_vm15, %vm1310_vm14  ;;  %v1328_v56 = vand.u32 2147483647, %v1300_v45  ;;  %v1330_v57 = vand.u32 2147483648, %v1300_v45  ;;  %vm1324_vm3 = vweird.f32 %v1300_v45 }
 0x424   : > { %v1306_v47 = vsub.f32 1.0, %v1305_v44 }
 0x425   : > { %v1331_v2 = vor.u32 1.1754944e-38, %v1330_v57  ;;  %vm1329_vm5 = vcmp.eq.f32.partialorder %v1328_v56, 8.507059e+37 }
 0x426   : > { %v1307_v48 = vmul.f32 %v3823_v42, %v1306_v47 }
 0x428   : > { %v1308_v43 = vadd.f32 %v3823_v42, %v1307_v48 }
 0x429   : > { %v3825_v49 = vpop.eup %3824 }
 0x42a   : > { %v1320_v50 = vmul.f32 %v3825_v49, %v1300_v45  ;;  %v1303_v51 = vpop.xlane.xlu2 %1302  ;;  %v1312_v60 = vsel %vm4420_vm0, %v3823_v42, %v1308_v43  ;;  %vm1325_vm1 = vweird.f32 %v3825_v49 }
 0x42b   : > { %3826 = vrcp.f32 %v1303_v51  ;;  %vm1326_vm4 = vmor %vm1324_vm3, %vm1325_vm1  ;;  %v1317_v3 = vsel %vm1314_vm2, %v1316_v63, %v1312_v60  ;;  %v1345_v17 = vand.u32 2147483648, %v1303_v51  ;;  %vm1339_vm7 = vweird.f32 %v1303_v51 }
 0x42c   : > { %v1321_v54 = vsub.f32 1.0, %v1320_v50  ;;  %v1318_v10 = vmul.f32 %v4388_v28, %v1317_v3  ;;  %v1343_v19 = vand.u32 2147483647, %v1303_v51 }
 0x42d   : > { %v1392_v58 = vpop.permute.xlu0 %1391  ;;  %v1346_v23 = vor.u32 1.1754944e-38, %v1345_v17 }
 0x42e   : > { %v1322_v61 = vmul.f32 %v3825_v49, %v1321_v54  ;;  %v1403_v62 = vsel %vm1245_vm10, %v1392_v58, 0  ;;  %vm1344_vm9 = vcmp.eq.f32.partialorder %v1343_v19, 8.507059e+37 }
 0x42f   : > { %1411 = vmatpush.bf16.xpose.msrb.mxu0 %v1403_v62  ;;  %3721 = vmatpush.bf16.xpose.msrb.mxu2 %v1403_v62 }
 0x430   : > { %v1323_v0 = vadd.f32 %v3825_v49, %v1322_v61 }
 0x431   : > { %v3827_v1 = vpop.eup %3826 }
 0x432   : > { %v1327_v4 = vsel %vm1326_vm4, %v3825_v49, %v1323_v0  ;;  %v1335_v6 = vmul.f32 %v3827_v1, %v1303_v51  ;;  %v1384_v9 = vpop.permute.xlu2 %1383  ;;  %vm1340_vm6 = vweird.f32 %v3827_v1 }
 0x433   : > { %v1332_v7 = vsel %vm1329_vm5, %v1331_v2, %v1327_v4  ;;  %vm1341_vm8 = vmor %vm1339_vm7, %vm1340_vm6 }
 0x434   : > { %v1336_v8 = vsub.f32 1.0, %v1335_v6  ;;  %v1333_v11 = vmul.f32 %v4392_v33, %v1332_v7 }
 0x435   : > { %v1612_v15 = vpop.permute.xlu0 %1611 }
 0x436   : > { %v1337_v12 = vmul.f32 %v3827_v1, %v1336_v8  ;;  %v1349_v14 = vpack.c.bf16 %v1333_v11, %v1318_v10  ;;  %v1623_v21 = vsel %vm1245_vm10, %v1612_v15, 0 }
 0x438   : > { %3253 = vmatmul.msk.bf16.vlgmr.msrb.gmra.mxu3 %vm1276_vm13, %v1349_v14  ;;  %v1338_v16 = vadd.f32 %v3827_v1, %v1337_v12 }
 0x43a   : > { %v1390_v18 = vpop.permute.xlu1 %1389  ;;  %v1342_v22 = vsel %vm1341_vm8, %v3827_v1, %v1338_v16  ;;  %v1386_v35 = vpop.permute.xlu2 %1385 }
 0x43b   : > { %v1400_v20 = vsel %vm1245_vm10, %v1390_v18, 0  ;;  %v1347_v24 = vsel %vm1344_vm9, %v1346_v23, %v1342_v22 }
 0x43c   : > { %1412 = vmatpush.bf16.xpose.msrb.mxu0 %v1400_v20  ;;  %3722 = vmatpush.bf16.xpose.msrb.mxu2 %v1400_v20  ;;  %v1348_v27 = vmul.f32 %v4396_v37, %v1347_v24 }
 0x43d   : > { %v1610_v25 = vpop.permute.xlu0 %1609 }
 0x43e   : > { %v1620_v29 = vsel %vm1245_vm10, %v1610_v25, 0  ;;  %v1350_v30 = vpack.c.bf16 %v1348_v27, %v1348_v27 }
 0x442   : > { %v1797_v26 = vpop.permute.xlu1 %1796  ;;  %v1795_v40 = vpop.permute.xlu2 %1794 }
 0x443   : > { %v1808_v28 = vsel %vm1245_vm10, %v1797_v26, 0  ;;  %3255 = vmatmul.msk.bf16.vlgmr.msrb.gmra.mxu0 %vm1245_vm10, %v1384_v9  ;;  %3256 = vmatmul.msk.bf16.vlgmr.msrb.gmra.mxu2 %vm1245_vm10, %v1386_v35  ;;  %v1805_v31 = vsel %vm1245_vm10, %v1795_v40, 0 }
 0x444   : > { %1631 = vmatpush.bf16.xpose.msra.mxu0 %v1623_v21  ;;  %1816 = vmatpush.bf16.xpose.msrb.mxu3 %v1808_v28 }
 0x445   : > { %v1791_v61 = vpop.permute.xlu0 %1790 }
 0x448   : > { %3254 = vmatmul.msk.bf16.gmra.mxu3 %vm1276_vm13, %v1350_v30 }
 0x44a   : > { %v1606_v33 = vpop.permute.xlu1 %1605  ;;  %v1608_v34 = vpop.permute.xlu2 %1607 }
 0x44c   : > { %1632 = vmatpush.bf16.xpose.msra.mxu0 %v1620_v29  ;;  %1817 = vmatpush.bf16.xpose.msrb.mxu3 %v1805_v31 }
 0x452   : > { %v1793_v63 = vpop.permute.xlu1 %1792 }
 0x453   : > { %3279 = vmatmul.msk.bf16.vlgmr.msra.gmra.mxu0 %vm1245_vm10, %v1606_v33 }
 0x463   : > { %3280 = vmatmul.msk.bf16.gmra.mxu0 %vm1245_vm10, %v1608_v34 }
 0x4bb   : > { %v1370_v36 = vpop.f32.mrf.mxu3 }
 0x4c0   : > { %v1414_v37 = vpop.f32.mrf.mxu0 }
 0x4c1   : > { %v1415_v38 = vadd.f32 %v1414_v37, %v4380_v13 }
 0x4c3   : > { %v1372_v39 = vpop.f32.mrf.mxu3  ;;  %v1423_v41 = vsel %vm1276_vm13, %v1415_v38, -inf }
 0x4c4   : > { %v1379_v42 = vpack.c.bf16 %v1372_v39, %v1370_v36  ;;  %1424 = vmax.xlane.f32.xlu0 %v1423_v41 }
 0x4c6   : > { %v1419_v44 = vpop.f32.mrf.mxu2  ;;  %3277 = vmatmul.msk.bf16.vlgmr.msra.gmra.mxu3 %vm1245_vm10, %v1379_v42 }
 0x4c7   : > { %v1420_v45 = vadd.f32 %v1419_v44, %v4380_v13 }
 0x4c8   : > { %v1416_v46 = vpop.f32.mrf.mxu0 }
 0x4c9   : > { %v1417_v47 = vadd.f32 %v1416_v46, %v4380_v13  ;;  %v1429_v48 = vsel %vm1276_vm13, %v1420_v45, -inf }
 0x4ca   : > { %1430 = vmax.xlane.f32.xlu1 %v1429_v48 }
 0x4cb   : > { %v1375_v49 = vpop.f32.mrf.mxu3  ;;  %v1426_v43 = vsel %vm1276_vm13, %v1417_v47, -inf }
 0x4cc   : > { %1427 = vmax.xlane.f32.xlu2 %v1426_v43  ;;  %v1380_v55 = vpack.c.bf16 %v1375_v49, %v1375_v49 }
 0x4ce   : > { %v1421_v50 = vpop.f32.mrf.mxu2 }
 0x4d0   : > { %v1634_v51 = vpop.f32.mrf.mxu0 }
 0x4d1   : > { %v4449_v52 = vadd.f32 %v1634_v51, %v4380_v13 }
 0x4d3   : > { %v1377_v53 = vpop.f32.mrf.mxu3  ;;  %v1643_v54 = vsel %vm1276_vm13, %v4449_v52, -inf }
 0x4d4   : > { %1644 = vmax.xlane.f32.xlu0 %v1643_v54 }
 0x4d6   : > { %3278 = vmatmul.msk.bf16.gmra.mxu3 %vm1245_vm10, %v1380_v55 }
 0x4d8   : > { %v1636_v56 = vpop.f32.mrf.mxu0 }
 0x4d9   : > { %v1637_v57 = vadd.f32 %v1636_v56, %v4380_v13 }
 0x4db   : > { %v1646_v58 = vsel %vm1276_vm13, %v1637_v57, -inf }
 0x4dc   : > { %1647 = vmax.xlane.f32.xlu2 %v1646_v58 }
 0x4e0   : > { %v1639_v60 = vpop.f32.mrf.mxu0 }
 0x4e1   : > { %v4473_v18 = vadd.f32 %v1639_v60, %v4380_v13 }
 0x4e3   : > { %v1649_v23 = vsel %vm1276_vm13, %v4473_v18, -inf }
 0x4e6   : > { %3293 = vmatmul.msk.bf16.vlgmr.msrb.gmra.mxu3 %vm1245_vm10, %v1791_v61 }
 0x4e8   : > { %v1641_v62 = vpop.f32.mrf.mxu0 }
 0x4f6   : > { %3294 = vmatmul.msk.bf16.gmra.mxu3 %vm1245_vm10, %v1793_v63 }
 0x537   : > { %v1425_v0 = vpop.xlane.xlu0 %1424 }
 0x538   : > { %v1432_v1 = vsub.f32 %v1415_v38, %v1425_v0 }
 0x53a   : > { %v1435_v2 = vmul.f32 1.442695, %v1432_v1 }
 0x53c   : > { %3828 = vpow2.f32 %v1435_v2 }
 0x53d   : > { %v1431_v3 = vpop.xlane.xlu1 %1430 }
 0x53e   : > { %v1434_v4 = vsub.f32 %v1420_v45, %v1431_v3 }
 0x53f   : > { %v1428_v6 = vpop.xlane.xlu2 %1427 }
 0x540   : > { %v1439_v7 = vmul.f32 1.442695, %v1434_v4  ;;  %v1433_v8 = vsub.f32 %v1417_v47, %v1428_v6 }
 0x542   : > { %v4458_v9 = vpop.eup %3828  ;;  %3830 = vpow2.f32 %v1439_v7  ;;  %v1437_v10 = vmul.f32 1.442695, %v1433_v8 }
 0x543   : > { %v1441_v11 = vsel %vm1276_vm13, %v4458_v9, 0.0 }
 0x544   : > { %3832 = vpow2.f32 %v1437_v10  ;;  %1442 = vadd.xlane.f32.xlu2 %v1441_v11 }
 0x547   : > { %v1645_v38 = vpop.xlane.xlu0 %1644 }
 0x548   : > { %v4462_v12 = vpop.eup %3830  ;;  %v1652_v39 = vsub.f32 %v4449_v52, %v1645_v38 }
 0x549   : > { %v4464_v14 = vpop.f32.mrf.mxu3  ;;  %v1447_v16 = vsel %vm1276_vm13, %v4462_v12, 0.0 }
 0x54a   : > { %v4466_v15 = vpop.eup %3832  ;;  %v1655_v41 = vmul.f32 1.442695, %v1652_v39 }
 0x54b   : > { %v1444_v17 = vsel %vm1276_vm13, %v4466_v15, 0.0 }
 0x54c   : > { %1448 = vadd.xlane.f32.xlu2 %v1447_v16  ;;  %1445 = vadd.xlane.f32.xlu1 %v1444_v17 }
 0x54f   : > { %v1648_v19 = vpop.xlane.xlu2 %1647 }
 0x550   : > { %v1653_v20 = vsub.f32 %v1637_v57, %v1648_v19 }
 0x551   : > { %v4475_v21 = vpop.f32.mrf.mxu3 }
 0x552   : > { %v1657_v22 = vmul.f32 1.442695, %v1653_v20 }
 0x554   : > { %3834 = vpow2.f32 %v1657_v22  ;;  %1650 = vmax.xlane.f32.xlu2 %v1649_v23 }
 0x555   : > { %3836 = vpow2.f32 %v1655_v41 }
 0x559   : > { %v4479_v35 = vpop.f32.mrf.mxu3 }
 0x55a   : > { %v4481_v24 = vpop.eup %3834 }
 0x55b   : > { %v1664_v25 = vsel %vm1276_vm13, %v4481_v24, 0.0  ;;  %v4501_v42 = vpop.eup %3836 }
 0x55c   : > { %1665 = vadd.xlane.f32.xlu2 %v1664_v25  ;;  %v1661_v44 = vsel %vm1276_vm13, %v4501_v42, 0.0 }
 0x561   : > { %v1603_v26 = vpop.f32.mrf.mxu3 }
 0x569   : > { %v1819_v27 = vpop.f32.mrf.mxu3 }
 0x56a   : > { %v1820_v28 = vadd.f32 %v1819_v27, %v4380_v13 }
 0x56c   : > { %v1828_v29 = vsel %vm1276_vm13, %v1820_v28, -inf }
 0x56d   : > { %1829 = vmax.xlane.f32.xlu1 %v1828_v29 }
 0x571   : > { %v1821_v30 = vpop.f32.mrf.mxu3 }
 0x572   : > { %v1822_v40 = vadd.f32 %v1821_v30, %v4380_v13 }
 0x574   : > { %1719 = vrot.lane.b32.xlu2 %v4369_v59, %s3998_s5  ;;  %v1831_v31 = vsel %vm1276_vm13, %v1822_v40, -inf }
 0x575   : > { %1832 = vmax.xlane.f32.xlu0 %v1831_v31 }
 0x579   : > { %v1824_v33 = vpop.f32.mrf.mxu3 }
 0x57a   : > { %v4496_v36 = vadd.f32 %v1824_v33, %v4380_v13 }
 0x57c   : > { %v1834_v37 = vsel %vm1276_vm13, %v4496_v36, -inf }
 0x581   : > { %v1826_v34 = vpop.f32.mrf.mxu3 }
 0x586   : > { %1499 = vrot.lane.b32.xlu1 %v4375_v5, %s3997_s23 }
 0x589   : > { %1501 = vrot.lane.b32.xlu0 %v4369_v59, %s3997_s23 }
 0x59d   : > { %1835 = vmax.xlane.f32.xlu2 %v1834_v37 }
 0x5b3   : > { %1662 = vadd.xlane.f32.xlu0 %v1661_v44 }
 0x5b7   : > { %v1443_v13 = vpop.xlane.xlu2 %1442 }
 0x5b8   : > { %v1461_v10 = vand.u32 2147483648, %v1443_v13  ;;  %vm1455_vm1 = vweird.f32 %v1443_v13  ;;  %v1459_v11 = vand.u32 2147483647, %v1443_v13 }
 0x5ba   : > { %v1462_v22 = vor.u32 1.1754944e-38, %v1461_v10  ;;  %vm1460_vm4 = vcmp.eq.f32.partialorder %v1459_v11, 8.507059e+37 }
 0x5bf   : > { %v1446_v45 = vpop.xlane.xlu1 %1445  ;;  %v4507_v46 = vpop.xlane.xlu2 %1448 }
 0x5c0   : > { %3838 = vrcp.f32 %v1446_v45  ;;  %v1476_v6 = vand.u32 2147483648, %v1446_v45  ;;  %vm1470_vm15 = vweird.f32 %v1446_v45  ;;  %v1474_v8 = vand.u32 2147483647, %v1446_v45 }
 0x5c1   : > { %3840 = vrcp.f32 %v1443_v13  ;;  %v1491_v39 = vand.u32 2147483648, %v4507_v46  ;;  %vm1485_vm6 = vweird.f32 %v4507_v46 }
 0x5c2   : > { %v1477_v19 = vor.u32 1.1754944e-38, %v1476_v6  ;;  %vm1475_vm3 = vcmp.eq.f32.partialorder %v1474_v8, 8.507059e+37 }
 0x5c3   : > { %v1492_v41 = vor.u32 1.1754944e-38, %v1491_v39 }
 0x5c6   : > { %v3839_v43 = vpop.eup %3838 }
 0x5c7   : > { %1717 = vrot.lane.b32.xlu0 %v4375_v5, %s3998_s5  ;;  %v3841_v50 = vpop.eup %3840  ;;  %v1466_v51 = vmul.f32 %v3839_v43, %v1446_v45  ;;  %v4509_v55 = vpop.xlane.xlu2 %1650  ;;  %vm1471_vm12 = vweird.f32 %v3839_v43  ;;  %s4952_s5 = sld [smem:[#allocation26_spill]] (!%p3563_p1) }
 0x5c8   : > { %v1451_v54 = vmul.f32 %v3841_v50, %v1443_v13  ;;  %vm1456_vm14 = vweird.f32 %v3841_v50  ;;  %vm1472_vm0 = vmor %vm1470_vm15, %vm1471_vm12 }
 0x5c9   : > { %v1467_v58 = vsub.f32 1.0, %v1466_v51  ;;  %vm1457_vm2 = vmor %vm1455_vm1, %vm1456_vm14 }
 0x5ca   : > { %v1452_v61 = vsub.f32 1.0, %v1451_v54 }
 0x5cb   : > { %v1468_v62 = vmul.f32 %v3839_v43, %v1467_v58 }
 0x5cc   : > { %v1453_v63 = vmul.f32 %v3841_v50, %v1452_v61 }
 0x5cd   : > { %v1469_v1 = vadd.f32 %v3839_v43, %v1468_v62 }
 0x5ce   : > { %v1454_v7 = vadd.f32 %v3841_v50, %v1453_v63 }
 0x5cf   : > { %v4518_v2 = vpop.xlane.xlu2 %1665  ;;  %v1473_v16 = vsel %vm1472_vm0, %v3839_v43, %v1469_v1 }
 0x5d0   : > { %v1458_v20 = vsel %vm1457_vm2, %v3841_v50, %v1454_v7  ;;  %v1478_v25 = vsel %vm1475_vm3, %v1477_v19, %v1473_v16  ;;  %v1696_v58 = vand.u32 2147483648, %v4518_v2  ;;  %vm1690_vm12 = vweird.f32 %v4518_v2 }
 0x5d1   : > { %v1479_v30 = vmul.f32 %v4466_v15, %v1478_v25  ;;  %v1489_v15 = vand.u32 2147483647, %v4507_v46 }
 0x5d3   : > { %vm1490_vm8 = vcmp.eq.f32.partialorder %v1489_v15, 8.507059e+37 }
 0x5d7   : > { %v1720_v29 = vpop.permute.xlu2 %1719 }
 0x5d8   : > { %v1729_v34 = vsel %vm1357_vm11, %v1720_v29, 0 }
 0x5e0   : > { %v1830_v47 = vpop.xlane.xlu1 %1829 }
 0x5e1   : > { %v1837_v48 = vsub.f32 %v1820_v28, %v1830_v47  ;;  %v1463_v28 = vsel %vm1460_vm4, %v1462_v22, %v1458_v20  ;;  %v3636_v22 = vld [vmem:[%s4200_s20 + $0x18] sm:$0xff] }
 0x5e2   : > { %v1464_v33 = vmul.f32 %v4458_v9, %v1463_v28  ;;  %1557 = vmatpush.bf16.msra.mxu2 %v3636_v22 }
 0x5e3   : > { %v1840_v49 = vmul.f32 1.442695, %v1837_v48 }
 0x5e4   : > { %v1495_v37 = vpack.c.bf16 %v1479_v30, %v1464_v33 }
 0x5e5   : > { %3842 = vpow2.f32 %v1840_v49 }
 0x5e8   : > { %v1833_v52 = vpop.xlane.xlu0 %1832 }
 0x5e9   : > { %v1838_v53 = vsub.f32 %v1822_v40, %v1833_v52 }
 0x5eb   : > { %v4511_v56 = vpop.eup %3842  ;;  %v1842_v57 = vmul.f32 1.442695, %v1838_v53 }
 0x5ec   : > { %v1846_v60 = vsel %vm1276_vm13, %v4511_v56, 0.0 }
 0x5ed   : > { %3844 = vpow2.f32 %v1842_v57  ;;  %1847 = vadd.xlane.f32.xlu1 %v1846_v60  ;;  %v1694_v60 = vand.u32 2147483647, %v4518_v2 }
 0x5ee   : > { %3846 = vrcp.f32 %v4507_v46 }
 0x5ef   : > { %vm1695_vm0 = vcmp.eq.f32.partialorder %v1694_v60, 8.507059e+37 }
 0x5f3   : > { %v4516_v0 = vpop.eup %3844 }
 0x5f4   : > { %v1849_v3 = vsel %vm1276_vm13, %v4516_v0, 0.0  ;;  %v3847_v4 = vpop.eup %3846 }
 0x5f5   : > { %1850 = vadd.xlane.f32.xlu2 %v1849_v3  ;;  %v1481_v17 = vmul.f32 %v3847_v4, %v4507_v46  ;;  %vm1486_vm5 = vweird.f32 %v3847_v4  ;;  %v1697_v3 = vor.u32 1.1754944e-38, %v1696_v58 }
 0x5f6   : > { %vm1487_vm7 = vmor %vm1485_vm6, %vm1486_vm5 }
 0x5f7   : > { %v1482_v26 = vsub.f32 1.0, %v1481_v17 }
 0x5f8   : > { %v1500_v31 = vpop.permute.xlu1 %1499 }
 0x5f9   : > { %v1483_v40 = vmul.f32 %v3847_v4, %v1482_v26 }
 0x5fb   : > { %v1502_v23 = vpop.permute.xlu0 %1501  ;;  %v1484_v38 = vadd.f32 %v3847_v4, %v1483_v40 }
 0x5fc   : > { %v1511_v27 = vsel %vm1357_vm11, %v1502_v23, 0 }
 0x5fd   : > { %1519 = vmatpush.bf16.msrb.mxu1 %v1511_v27  ;;  %v1488_v9 = vsel %vm1487_vm7, %v3847_v4, %v1484_v38  ;;  %v3635_v27 = vld [vmem:[%s4200_s20 + $0x10] sm:$0xff] }
 0x5fe   : > { %v1493_v44 = vsel %vm1490_vm8, %v1492_v41, %v1488_v9  ;;  %1558 = vmatpush.bf16.msra.mxu2 %v3635_v27 }
 0x5ff   : > { %v1494_v13 = vmul.f32 %v4462_v12, %v1493_v44  ;;  %v1654_v12 = vsub.f32 %v4473_v18, %v4509_v55 }
 0x601   : > { %1520 = vmatpush.bf16.msrb.mxu1 %v1500_v31  ;;  %v1496_v48 = vpack.c.bf16 %v1494_v13, %v1494_v13  ;;  %v1659_v51 = vmul.f32 1.442695, %v1654_v12 }
 0x604   : > { %3257 = vmatmul.msk.bf16.vlgmr.msrb.gmra.mxu1 %vm1276_vm13, %v1495_v37 }
 0x605   : > { %1737 = vmatpush.bf16.msra.mxu1 %v1729_v34 }
 0x606   : > { %1902 = vrot.lane.b32.xlu1 %v4375_v5, %s3999_s6 }
 0x60d   : > { %1904 = vrot.lane.b32.xlu2 %v4369_v59, %s3999_s6 }
 0x610   : > { %v1836_v45 = vpop.xlane.xlu2 %1835 }
 0x611   : > { %v1839_v47 = vsub.f32 %v4496_v36, %v1836_v45 }
 0x613   : > { %v1844_v49 = vmul.f32 1.442695, %v1839_v47 }
 0x614   : > { %3258 = vmatmul.msk.bf16.gmra.mxu1 %vm1276_vm13, %v1496_v48 }
 0x615   : > { %3848 = vpow2.f32 %v1844_v49 }
 0x616   : > { %3850 = vrcp.f32 %v4518_v2 }
 0x61b   : > { %v4539_v5 = vpop.eup %3848 }
 0x61c   : > { %v1852_v46 = vsel %vm1276_vm13, %v4539_v5, 0.0  ;;  %v3851_v43 = vpop.eup %3850 }
 0x61d   : > { %1853 = vadd.xlane.f32.xlu0 %v1852_v46  ;;  %v1686_v59 = vmul.f32 %v3851_v43, %v4518_v2  ;;  %vm1691_vm9 = vweird.f32 %v3851_v43 }
 0x61e   : > { %vm1692_vm14 = vmor %vm1690_vm12, %vm1691_vm9 }
 0x61f   : > { %v1687_v36 = vsub.f32 1.0, %v1686_v59 }
 0x621   : > { %v1688_v52 = vmul.f32 %v3851_v43, %v1687_v36 }
 0x623   : > { %v1689_v54 = vadd.f32 %v3851_v43, %v1688_v52 }
 0x625   : > { %v1693_v55 = vsel %vm1692_vm14, %v3851_v43, %v1689_v54 }
 0x626   : > { %v1663_v50 = vpop.xlane.xlu0 %1662  ;;  %v1698_v6 = vsel %vm1695_vm0, %v1697_v3, %v1693_v55 }
 0x627   : > { %3852 = vrcp.f32 %v1663_v50  ;;  %v1681_v62 = vand.u32 2147483648, %v1663_v50  ;;  %v1679_v1 = vand.u32 2147483647, %v1663_v50  ;;  %vm1675_vm1 = vweird.f32 %v1663_v50 }
 0x628   : > { %3854 = vpow2.f32 %v1659_v51  ;;  %v1699_v11 = vmul.f32 %v4481_v24, %v1698_v6  ;;  %v3637_v6 = vld [vmem:[%s4200_s20 + $0x20] sm:$0xff] }
 0x629   : > { %v1682_v7 = vor.u32 1.1754944e-38, %v1681_v62  ;;  %vm1680_vm3 = vcmp.eq.f32.partialorder %v1679_v1, 8.507059e+37 }
 0x62d   : > { %v3853_v53 = vpop.eup %3852 }
 0x62e   : > { %v1671_v57 = vmul.f32 %v3853_v53, %v1663_v50  ;;  %v4549_v18 = vpop.eup %3854  ;;  %vm1676_vm15 = vweird.f32 %v3853_v53 }
 0x62f   : > { %vm1677_vm2 = vmor %vm1675_vm1, %vm1676_vm15  ;;  %v1667_v2 = vsel %vm1276_vm13, %v4549_v18, 0.0 }
 0x630   : > { %v1672_v61 = vsub.f32 1.0, %v1671_v57 }
 0x632   : > { %v1673_v63 = vmul.f32 %v3853_v53, %v1672_v61 }
 0x634   : > { %v1674_v4 = vadd.f32 %v3853_v53, %v1673_v63 }
 0x636   : > { %v1678_v8 = vsel %vm1677_vm2, %v3853_v53, %v1674_v4  ;;  %1668 = vadd.xlane.f32.xlu2 %v1667_v2 }
 0x637   : > { %v1683_v10 = vsel %vm1680_vm3, %v1682_v7, %v1678_v8 }
 0x638   : > { %v1684_v16 = vmul.f32 %v4501_v42, %v1683_v10 }
 0x639   : > { %v1718_v17 = vpop.permute.xlu0 %1717 }
 0x63a   : > { %1738 = vmatpush.bf16.msra.mxu1 %v1718_v17  ;;  %v1715_v19 = vpack.c.bf16 %v1699_v11, %v1684_v16 }
 0x63d   : > { %3281 = vmatmul.msk.bf16.vlgmr.msra.gmra.mxu1 %vm1276_vm13, %v1715_v19 }
 0x660   : > { %v1848_v20 = vpop.xlane.xlu1 %1847 }
 0x661   : > { %3856 = vrcp.f32 %v1848_v20  ;;  %v1866_v31 = vand.u32 2147483648, %v1848_v20  ;;  %vm1860_vm5 = vweird.f32 %v1848_v20  ;;  %v1864_v34 = vand.u32 2147483647, %v1848_v20 }
 0x663   : > { %v1867_v41 = vor.u32 1.1754944e-38, %v1866_v31  ;;  %vm1865_vm8 = vcmp.eq.f32.partialorder %v1864_v34, 8.507059e+37 }
 0x667   : > { %v3857_v23 = vpop.eup %3856 }
 0x668   : > { %v1856_v25 = vmul.f32 %v3857_v23, %v1848_v20  ;;  %v1851_v26 = vpop.xlane.xlu2 %1850  ;;  %vm1861_vm4 = vweird.f32 %v3857_v23 }
 0x669   : > { %3858 = vrcp.f32 %v1851_v26  ;;  %vm1862_vm6 = vmor %vm1860_vm5, %vm1861_vm4  ;;  %v1881_v38 = vand.u32 2147483648, %v1851_v26  ;;  %v1879_v9 = vand.u32 2147483647, %v1851_v26  ;;  %vm1875_vm9 = vweird.f32 %v1851_v26 }
 0x66a   : > { %v1857_v28 = vsub.f32 1.0, %v1856_v25 }
 0x66b   : > { %v1882_v45 = vor.u32 1.1754944e-38, %v1881_v38  ;;  %vm1880_vm14 = vcmp.eq.f32.partialorder %v1879_v9, 8.507059e+37 }
 0x66c   : > { %v1858_v29 = vmul.f32 %v3857_v23, %v1857_v28 }
 0x66e   : > { %v1859_v30 = vadd.f32 %v3857_v23, %v1858_v29 }
 0x66f   : > { %v3859_v24 = vpop.eup %3858 }
 0x670   : > { %v1871_v42 = vmul.f32 %v3859_v24, %v1851_v26  ;;  %v1905_v40 = vpop.permute.xlu2 %1904  ;;  %v1863_v39 = vsel %vm1862_vm6, %v3857_v23, %v1859_v30  ;;  %vm1876_vm7 = vweird.f32 %v3859_v24  ;;  %v3639_v30 = vld [vmem:[%s4200_s20 + $0x30] sm:$0xff] }
 0x671   : > { %v1914_v33 = vsel %vm1357_vm11, %v1905_v40, 0  ;;  %v1868_v13 = vsel %vm1865_vm8, %v1867_v41, %v1863_v39  ;;  %vm1877_vm12 = vmor %vm1875_vm9, %vm1876_vm7 }
 0x672   : > { %v1872_v37 = vsub.f32 1.0, %v1871_v42  ;;  %1922 = vmatpush.bf16.msrb.mxu0 %v1914_v33  ;;  %v1869_v46 = vmul.f32 %v4511_v56, %v1868_v13  ;;  %v3638_v56 = vld [vmem:[%s4200_s20 + $0x28] sm:$0xff] }
 0x673   : > { %1775 = vmatpush.bf16.msrb.mxu2 %v3638_v56 }
 0x674   : > { %v1873_v15 = vmul.f32 %v3859_v24, %v1872_v37 }
 0x676   : > { %v1874_v44 = vadd.f32 %v3859_v24, %v1873_v15 }
 0x677   : > { %1776 = vmatpush.bf16.msrb.mxu2 %v3637_v6 }
 0x678   : > { %v1878_v47 = vsel %vm1877_vm12, %v3859_v24, %v1874_v44  ;;  %v1903_v48 = vpop.permute.xlu1 %1902  ;;  %v3640_v24 = vld [vmem:[%s4200_s20 + $0x38] sm:$0xff] }
 0x679   : > { %v1883_v49 = vsel %vm1880_vm14, %v1882_v45, %v1878_v47  ;;  %1923 = vmatpush.bf16.msrb.mxu0 %v1903_v48  ;;  %1960 = vmatpush.bf16.msrb.mxu1 %v3640_v24  ;;  %v3670_v24 = vld [vmem:[%s4224_s3 + $0xec] sm:$0xf] }
 0x67a   : > { %v1884_v43 = vmul.f32 %v4516_v0, %v1883_v49 }
 0x67c   : > { %v1900_v59 = vpack.c.bf16 %v1884_v43, %v1869_v46  ;;  %v3804_v46 = vld [vmem:[%s4945_s1] ss:$0 sm:$0xff]  ;;  %v3894_v43 = vld [vmem:[#allocation2 + $0x10] sm:$0xff] }
 0x67d   : > { %1961 = vmatpush.bf16.msrb.mxu1 %v3639_v30  ;;  %v3431_v30 = vld [vmem:[%s4224_s3 + $0xf8] sm:$0xf0] }
 0x67e   : > { %3295 = vmatmul.msk.bf16.vlgmr.msrb.gmra.mxu0 %vm1276_vm13, %v1900_v59 }
 0x681   : > { %v1522_v12 = vpop.f32.mrf.mxu1 }
 0x689   : > { %v1524_v36 = vpop.f32.mrf.mxu1 }
 0x68a   : > { %v1531_v50 = vpack.c.bf16 %v1524_v36, %v1522_v12 }
 0x68c   : > { %3267 = vmatmul.msk.bf16.vlgmr.msra.gmra.mxu2 %vm1245_vm10, %v1531_v50 }
 0x690   : > { %v1854_v51 = vpop.xlane.xlu0 %1853 }
 0x691   : > { %3860 = vrcp.f32 %v1854_v51  ;;  %v1527_v52 = vpop.f32.mrf.mxu1  ;;  %v1896_v61 = vand.u32 2147483648, %v1854_v51  ;;  %v1894_v62 = vand.u32 2147483647, %v1854_v51  ;;  %vm1890_vm15 = vweird.f32 %v1854_v51 }
 0x692   : > { %v1532_v60 = vpack.c.bf16 %v1527_v52, %v1527_v52 }
 0x693   : > { %v1897_v63 = vor.u32 1.1754944e-38, %v1896_v61  ;;  %vm1895_vm1 = vcmp.eq.f32.partialorder %v1894_v62, 8.507059e+37  ;;  %v3896_v62 = vld [vmem:[#allocation2 + $0x8] sm:$0xff] }
 0x697   : > { %v3861_v53 = vpop.eup %3860 }
 0x698   : > { %v1886_v54 = vmul.f32 %v3861_v53, %v1854_v51  ;;  %vm1891_vm11 = vweird.f32 %v3861_v53 }
 0x699   : > { %v1529_v57 = vpop.f32.mrf.mxu1  ;;  %vm1892_vm0 = vmor %vm1890_vm15, %vm1891_vm11 }
 0x69a   : > { %v1887_v58 = vsub.f32 1.0, %v1886_v54 }
 0x69c   : > { %v1888_v0 = vmul.f32 %v3861_v53, %v1887_v58  ;;  %3268 = vmatmul.msk.bf16.gmra.mxu2 %vm1245_vm10, %v1532_v60 }
 0x69e   : > { %v1889_v55 = vadd.f32 %v3861_v53, %v1888_v0 }
 0x6a0   : > { %v1893_v1 = vsel %vm1892_vm0, %v3861_v53, %v1889_v55  ;;  %v3895_v53 = vld [vmem:[#allocation2] sm:$0xff] }
 0x6a1   : > { %v1898_v3 = vsel %vm1895_vm1, %v1897_v63, %v1893_v1 }
 0x6a2   : > { %v1899_v4 = vmul.f32 %v4539_v5, %v1898_v3 }
 0x6a4   : > { %v1901_v7 = vpack.c.bf16 %v1899_v4, %v1899_v4 }
 0x6a6   : > { %3296 = vmatmul.msk.bf16.gmra.mxu0 %vm1276_vm13, %v1901_v7 }
 0x6a9   : > { %v1669_v2 = vpop.xlane.xlu2 %1668 }
 0x6aa   : > { %3862 = vrcp.f32 %v1669_v2  ;;  %v1711_v16 = vand.u32 2147483648, %v1669_v2  ;;  %v1709_v19 = vand.u32 2147483647, %v1669_v2  ;;  %vm1705_vm3 = vweird.f32 %v1669_v2 }
 0x6ac   : > { %v1712_v5 = vor.u32 1.1754944e-38, %v1711_v16  ;;  %vm1710_vm5 = vcmp.eq.f32.partialorder %v1709_v19, 8.507059e+37 }
 0x6b0   : > { %v3863_v8 = vpop.eup %3862 }
 0x6b1   : > { %v1701_v10 = vmul.f32 %v3863_v8, %v1669_v2  ;;  %vm1706_vm2 = vweird.f32 %v3863_v8 }
 0x6b2   : > { %vm1707_vm4 = vmor %vm1705_vm3, %vm1706_vm2 }
 0x6b3   : > { %v1702_v11 = vsub.f32 1.0, %v1701_v10 }
 0x6b5   : > { %v1703_v17 = vmul.f32 %v3863_v8, %v1702_v11 }
 0x6b7   : > { %v1704_v20 = vadd.f32 %v3863_v8, %v1703_v17 }
 0x6b9   : > { %v1708_v22 = vsel %vm1707_vm4, %v3863_v8, %v1704_v20  ;;  %v3421_v20 = vld [vmem:[%s4224_s3 + $0xe0] sm:$0xf] }
 0x6ba   : > { %v1740_v23 = vpop.f32.mrf.mxu1  ;;  %v1713_v25 = vsel %vm1710_vm5, %v1712_v5, %v1708_v22  ;;  %v3671_v5 = vld [vmem:[%s4224_s3 + $0xec] sm:$0xf0]  ;;  %v3669_v22 = vld [vmem:[%s4224_s3 + $0xe4] sm:$0xf] }
 0x6bb   : > { %v1714_v26 = vmul.f32 %v4549_v18, %v1713_v25  ;;  %v3423_v25 = vld [vmem:[%s4224_s3 + $0xf0] sm:$0xf0] }
 0x6bd   : > { %v1716_v27 = vpack.c.bf16 %v1714_v26, %v1714_v26  ;;  %v3429_v26 = vld [vmem:[%s4224_s3 + $0xe8] sm:$0xf] }
 0x6bf   : > { %3282 = vmatmul.msk.bf16.gmra.mxu1 %vm1276_vm13, %v1716_v27  ;;  %v3672_v27 = vld [vmem:[%s4224_s3 + $0xf4] sm:$0xf0] }
 0x6c2   : > { %v1742_v28 = vpop.f32.mrf.mxu1 }
 0x6c3   : > { %v1749_v29 = vpack.c.bf16 %v1742_v28, %v1740_v23  ;;  %v3422_v23 = vor.u32 %v3671_v5, %v3421_v20  ;;  %v3426_v28 = vor.u32 %v3669_v22, %v3423_v25  ;;  %v3654_v20 = vld [vmem:[%s4224_s3 + $0x6c] sm:$0xf]  ;;  %v3367_v5 = vld [vmem:[%s4224_s3 + $0x78] sm:$0xf0]  ;;  %v3651_v25 = vld [vmem:[%s4224_s3 + $0x4c] sm:$0xf0] }
 0x6c4   : > { %v3370_v22 = vor.u32 %v3654_v20, %v3367_v5  ;;  %v3805_v5 = vld [vmem:[%s4946_s21] ss:$0 sm:$0xff] }
 0x6c5   : > { %3291 = vmatmul.msk.bf16.vlgmr.msrb.gmra.mxu2 %vm1245_vm10, %v1749_v29  ;;  %v3430_v29 = vor.u32 %v3672_v27, %v3429_v26  ;;  %2281 = vmatpush.bf16.msra.mxu3 %v3426_v28  ;;  %v3649_v26 = vld [vmem:[%s4224_s3 + $0x44] sm:$0xf]  ;;  %v3343_v28 = vld [vmem:[%s4224_s3 + $0x50] sm:$0xf0] }
 0x6c6   : > { %2263 = vmatpush.bf16.msra.mxu2 %v3422_v23  ;;  %v3341_v23 = vld [vmem:[%s4224_s3 + $0x40] sm:$0xf] }
 0x6c7   : > { %2299 = vmatpush.bf16.msra.mxu0 %v3430_v29  ;;  %v3342_v27 = vor.u32 %v3651_v25, %v3341_v23  ;;  %v3349_v29 = vld [vmem:[%s4224_s3 + $0x48] sm:$0xf] }
 0x6fb   : > { %v1925_v42 = vpop.f32.mrf.mxu0 }
 0x703   : > { %v1927_v40 = vpop.f32.mrf.mxu0 }
 0x704   : > { %v1934_v31 = vpack.c.bf16 %v1927_v40, %v1925_v42  ;;  %v3434_v42 = vor.u32 %v3670_v24, %v3431_v30  ;;  %v3405_v40 = vld [vmem:[%s4224_s3 + $0xc0] sm:$0xf]  ;;  %v3652_v24 = vld [vmem:[%s4224_s3 + $0x54] sm:$0xf0]  ;;  %v3346_v30 = vor.u32 %v3649_v26, %v3343_v28 }
 0x706   : > { %3305 = vmatmul.msk.bf16.vlgmr.msrb.gmra.mxu1 %vm1245_vm10, %v1934_v31  ;;  %v3667_v31 = vld [vmem:[%s4224_s3 + $0xcc] sm:$0xf0] }
 0x707   : > { %2317 = vmatpush.bf16.msra.mxu1 %v3434_v42  ;;  %v3350_v42 = vor.u32 %v3652_v24, %v3349_v29 }
 0x70f   : > { %v1560_v33 = vpop.f32.mrf.mxu2 }
 0x710   : > { %v1597_v45 = vadd.f32 %v4464_v14, %v1560_v33  ;;  %v3665_v33 = vld [vmem:[%s4224_s3 + $0xc4] sm:$0xf] }
 0x717   : > { %v1562_v34 = vpop.f32.mrf.mxu2 }
 0x718   : > { %v1599_v36 = vadd.f32 %v4475_v21, %v1562_v34  ;;  %v3406_v34 = vor.u32 %v3667_v31, %v3405_v40  ;;  %v3650_v40 = vld [vmem:[%s4224_s3 + $0x4c] sm:$0xf]  ;;  %v3351_v31 = vld [vmem:[%s4224_s3 + $0x58] sm:$0xf0] }
 0x71a   : > { %2264 = vmatpush.bf16.msra.mxu2 %v3406_v34  ;;  %v3325_v34 = vld [vmem:[%s4224_s3 + $0x20] sm:$0xf] }
 0x71f   : > { %v1565_v18 = vpop.f32.mrf.mxu2 }
 0x720   : > { %v1602_v56 = vadd.f32 %v4479_v35, %v1565_v18  ;;  %v3407_v18 = vld [vmem:[%s4224_s3 + $0xd0] sm:$0xf0] }
 0x723   : > { %v1930_v37 = vpop.f32.mrf.mxu0 }
 0x724   : > { %v1935_v38 = vpack.c.bf16 %v1930_v37, %v1930_v37  ;;  %v3413_v37 = vld [vmem:[%s4224_s3 + $0xc8] sm:$0xf] }
 0x726   : > { %3306 = vmatmul.msk.bf16.gmra.mxu1 %vm1245_vm10, %v1935_v38  ;;  %v3668_v38 = vld [vmem:[%s4224_s3 + $0xd4] sm:$0xf0] }
 0x727   : > { %v1567_v39 = vpop.f32.mrf.mxu2 }
 0x728   : > { %v3410_v39 = vor.u32 %v3665_v33, %v3407_v18  ;;  %v3354_v33 = vor.u32 %v3650_v40, %v3351_v31  ;;  %v3647_v18 = vld [vmem:[%s4224_s3 + $0x2c] sm:$0xf0] }
 0x72a   : > { %2282 = vmatpush.bf16.msra.mxu3 %v3410_v39  ;;  %v3326_v39 = vor.u32 %v3647_v18, %v3325_v34 }
 0x72b   : > { %v1932_v15 = vpop.f32.mrf.mxu0 }
 0x72c   : > { %v3414_v15 = vor.u32 %v3668_v38, %v3413_v37  ;;  %v3645_v37 = vld [vmem:[%s4224_s3 + $0x24] sm:$0xf] }
 0x72e   : > { %2300 = vmatpush.bf16.msra.mxu0 %v3414_v15  ;;  %v3327_v15 = vld [vmem:[%s4224_s3 + $0x30] sm:$0xf0] }
 0x73c   : > { %v1745_v9 = vpop.f32.mrf.mxu1 }
 0x73d   : > { %v1750_v41 = vpack.c.bf16 %v1745_v9, %v1745_v9  ;;  %v3666_v9 = vld [vmem:[%s4224_s3 + $0xcc] sm:$0xf] }
 0x73f   : > { %3292 = vmatmul.msk.bf16.gmra.mxu2 %vm1245_vm10, %v1750_v41  ;;  %v3415_v41 = vld [vmem:[%s4224_s3 + $0xd8] sm:$0xf0] }
 0x744   : > { %v1747_v44 = vpop.f32.mrf.mxu1 }
 0x745   : > { %v3418_v44 = vor.u32 %v3666_v9, %v3415_v41  ;;  %v3333_v9 = vld [vmem:[%s4224_s3 + $0x28] sm:$0xf]  ;;  %v3648_v41 = vld [vmem:[%s4224_s3 + $0x34] sm:$0xf0] }
 0x747   : > { %2318 = vmatpush.bf16.msra.mxu1 %v3418_v44 }
 0x748   : > { %v1778_v13 = vpop.f32.mrf.mxu2 }
 0x749   : > { %v1787_v47 = vadd.f32 %v1778_v13, %v1597_v45  ;;  %v3389_v13 = vld [vmem:[%s4224_s3 + $0xa0] sm:$0xf]  ;;  %v3663_v45 = vld [vmem:[%s4224_s3 + $0xac] sm:$0xf0] }
 0x750   : > { %v1780_v12 = vpop.f32.mrf.mxu2 }
 0x751   : > { %v1788_v51 = vadd.f32 %v1780_v12, %v1599_v36  ;;  %v3662_v36 = vld [vmem:[%s4224_s3 + $0xac] sm:$0xf] }
 0x783   : > { %v1963_v48 = vpop.f32.mrf.mxu1 }
 0x784   : > { %v1972_v49 = vadd.f32 %v1963_v48, %v1787_v47  ;;  %v3661_v47 = vld [vmem:[%s4224_s3 + $0xa4] sm:$0xf]  ;;  %v3390_v48 = vor.u32 %v3663_v45, %v3389_v13  ;;  %v3330_v13 = vor.u32 %v3645_v37, %v3327_v15  ;;  %v3334_v45 = vor.u32 %v3648_v41, %v3333_v9 }
 0x786   : > { %v1975_v59 = vadd.f32 %v3894_v43, %v1972_v49  ;;  %v3391_v49 = vld [vmem:[%s4224_s3 + $0xb0] sm:$0xf0]  ;;  %v3664_v43 = vld [vmem:[%s4224_s3 + $0xb4] sm:$0xf0]  ;;  %2265 = vmatpush.bf16.msra.mxu2 %v3390_v48  ;;  %v3335_v48 = vld [vmem:[%s4224_s3 + $0x38] sm:$0xf0] }
 0x788   : > { %v4583_v50 = vadd.f32 %v3804_v46, %v1975_v59  ;;  %v3394_v59 = vor.u32 %v3661_v47, %v3391_v49  ;;  %v3646_v47 = vld [vmem:[%s4224_s3 + $0x2c] sm:$0xf]  ;;  %v3309_v49 = vld [vmem:[%s4224_s3] sm:$0xf] }
 0x78a   : > { %1987 = vadd.xlane.f32.xlu1 %v4583_v50  ;;  %2283 = vmatpush.bf16.msra.mxu3 %v3394_v59  ;;  %v3641_v59 = vld [vmem:[%s4224_s3 + $0x4] sm:$0xf] }
 0x78b   : > { %v1965_v52 = vpop.f32.mrf.mxu1 }
 0x78c   : > { %v1973_v14 = vadd.f32 %v1965_v52, %v1788_v51  ;;  %v3399_v51 = vld [vmem:[%s4224_s3 + $0xb8] sm:$0xf0] }
 0x78d   : > { %v3402_v52 = vor.u32 %v3662_v36, %v3399_v51 }
 0x78e   : > { %v1976_v54 = vadd.f32 %v3895_v53, %v1973_v14  ;;  %v3373_v14 = vld [vmem:[%s4224_s3 + $0x80] sm:$0xf]  ;;  %v3659_v53 = vld [vmem:[%s4224_s3 + $0x8c] sm:$0xf0] }
 0x78f   : > { %2319 = vmatpush.bf16.msra.mxu1 %v3402_v52 }
 0x790   : > { %v4586_v57 = vadd.f32 %v3804_v46, %v1976_v54  ;;  %v3657_v54 = vld [vmem:[%s4224_s3 + $0x84] sm:$0xf] }
 0x792   : > { %1989 = vadd.xlane.f32.xlu2 %v4586_v57 }
 0x7a3   : > { %v1968_v58 = vpop.f32.mrf.mxu1 }
 0x7ab   : > { %v1970_v60 = vpop.f32.mrf.mxu1 }
 0x7ac   : > { %v3375_v60 = vld [vmem:[%s4224_s3 + $0x90] sm:$0xf0] }
 0x7c2   : > { %v1783_v61 = vpop.f32.mrf.mxu2 }
 0x7c3   : > { %v1789_v0 = vadd.f32 %v1783_v61, %v1602_v56  ;;  %v3381_v56 = vld [vmem:[%s4224_s3 + $0x88] sm:$0xf]  ;;  %v3660_v61 = vld [vmem:[%s4224_s3 + $0x94] sm:$0xf0] }
 0x7c5   : > { %v1974_v21 = vadd.f32 %v1968_v58, %v1789_v0  ;;  %v3374_v58 = vor.u32 %v3659_v53, %v3373_v14  ;;  %v3378_v0 = vor.u32 %v3657_v54, %v3375_v60  ;;  %v3317_v14 = vld [vmem:[%s4224_s3 + $0x8] sm:$0xf]  ;;  %v3644_v53 = vld [vmem:[%s4224_s3 + $0x14] sm:$0xf0]  ;;  %v3319_v60 = vld [vmem:[%s4224_s3 + $0x18] sm:$0xf0] }
 0x7c6   : > { %v3318_v54 = vor.u32 %v3644_v53, %v3317_v14  ;;  %v3692_v14 = vld [vmem:[%s4234_s28 + $0x98] sm:$0xff] }
 0x7c7   : > { %v1977_v55 = vadd.f32 %v3896_v62, %v1974_v21  ;;  %v3382_v21 = vor.u32 %v3660_v61, %v3381_v56  ;;  %v3658_v62 = vld [vmem:[%s4224_s3 + $0x8c] sm:$0xf]  ;;  %2266 = vmatpush.bf16.msra.mxu2 %v3374_v58  ;;  %2284 = vmatpush.bf16.msra.mxu3 %v3378_v0  ;;  %v3700_v53 = vld [vmem:[%s4234_s28 + $0xd8] sm:$0xff] }
 0x7c8   : > { %v3642_v58 = vld [vmem:[%s4224_s3 + $0xc] sm:$0xf] }
 0x7c9   : > { %v4590_v63 = vadd.f32 %v3804_v46, %v1977_v55  ;;  %v3397_v46 = vld [vmem:[%s4224_s3 + $0xa8] sm:$0xf]  ;;  %v3383_v55 = vld [vmem:[%s4224_s3 + $0x98] sm:$0xf0]  ;;  %v3322_v56 = vor.u32 %v3642_v58, %v3319_v60  ;;  %v3685_v58 = vld [vmem:[%s4234_s28 + $0x60] sm:$0xff] }
 0x7ca   : > { %v1785_v1 = vpop.f32.mrf.mxu2  ;;  %v3398_v12 = vor.u32 %v3664_v43, %v3397_v46  ;;  %v3338_v46 = vor.u32 %v3646_v47, %v3335_v48  ;;  %v3643_v43 = vld [vmem:[%s4224_s3 + $0xc] sm:$0xf0]  ;;  %v3680_v47 = vld [vmem:[%s4234_s28 + $0x38] sm:$0xff] }
 0x7cb   : > { %1991 = vadd.xlane.f32.xlu0 %v4590_v63  ;;  %v3386_v1 = vor.u32 %v3658_v62, %v3383_v55  ;;  %v3310_v51 = vor.u32 %v3643_v43, %v3309_v49  ;;  %v3688_v48 = vld [vmem:[%s4234_s28 + $0x78] sm:$0xff]  ;;  %v3694_v49 = vld [vmem:[%s4234_s28 + $0xa8] sm:$0xff]  ;;  %v3679_v43 = vld [vmem:[%s4234_s28 + $0x30] sm:$0xff] }
 0x7cc   : > { %2301 = vmatpush.bf16.msra.mxu0 %v3398_v12  ;;  %v3311_v12 = vld [vmem:[%s4224_s3 + $0x10] sm:$0xf0] }
 0x7cd   : > { %2320 = vmatpush.bf16.msra.mxu1 %v3386_v1  ;;  %v3314_v52 = vor.u32 %v3641_v59, %v3311_v12  ;;  %v3687_v59 = vld [vmem:[%s4234_s28 + $0x70] sm:$0xff]  ;;  %v3693_v12 = vld [vmem:[%s4234_s28 + $0xa0] sm:$0xff] }
 0x7ce   : > { %v3691_v60 = vld [vmem:[%s4234_s28 + $0x90] sm:$0xff] }
 0x7d0   : > { %2302 = vmatpush.bf16.msra.mxu0 %v3382_v21 }
 0x7d1   : > { %2321 = vmatpush.bf16.msra.mxu1 %v3370_v22 }
 0x7d5   : > { %2322 = vmatpush.bf16.msra.mxu1 %v3354_v33 }
 0x7d9   : > { %2323 = vmatpush.bf16.msra.mxu1 %v3338_v46  ;;  %v3702_v46 = vld [vmem:[%s4234_s28 + $0xe8] sm:$0xff] }
 0x7dd   : > { %2324 = vmatpush.bf16.msra.mxu1 %v3322_v56  ;;  %v3699_v56 = vld [vmem:[%s4234_s28 + $0xd0] sm:$0xff] }
 0x7fd   : > { %v1988_v3 = vpop.xlane.xlu1 %1987 }
 0x7fe   : > { %v1993_v4 = vmul.f32 %v1988_v3, %v4281_v32  ;;  %v3357_v3 = vld [vmem:[%s4224_s3 + $0x60] sm:$0xf] }
 0x800   : > { %v4595_v6 = vsub.f32 %v4583_v50, %v1993_v4  ;;  %v3655_v4 = vld [vmem:[%s4224_s3 + $0x6c] sm:$0xf0] }
 0x802   : > { %v1999_v35 = vmul.f32 %v4595_v6, %v4595_v6 }
 0x804   : > { %2002 = vadd.xlane.f32.xlu2 %v1999_v35  ;;  %v3653_v35 = vld [vmem:[%s4224_s3 + $0x64] sm:$0xf] }
 0x805   : > { %v1990_v7 = vpop.xlane.xlu2 %1989 }
 0x806   : > { %v1994_v2 = vmul.f32 %v1990_v7, %v4281_v32  ;;  %v3358_v7 = vor.u32 %v3655_v4, %v3357_v3 }
 0x808   : > { %v4601_v8 = vsub.f32 %v4586_v57, %v1994_v2  ;;  %v3359_v2 = vld [vmem:[%s4224_s3 + $0x70] sm:$0xf0]  ;;  %2267 = vmatpush.bf16.msra.mxu2 %v3358_v7 }
 0x80a   : > { %v2000_v10 = vmul.f32 %v4601_v8, %v4601_v8 }
 0x80c   : > { %2004 = vadd.xlane.f32.xlu0 %v2000_v10  ;;  %v3365_v10 = vld [vmem:[%s4224_s3 + $0x68] sm:$0xf]  ;;  %2268 = vmatpush.bf16.msra.mxu2 %v3342_v27  ;;  %v3806_v27 = vld [vmem:[%s4947_s15] ss:$0 sm:$0xff] }
 0x810   : > { %2269 = vmatpush.bf16.msra.mxu2 %v3326_v39 }
 0x814   : > { %2270 = vmatpush.bf16.msra.mxu2 %v3310_v51  ;;  %v3678_v51 = vld [vmem:[%s4234_s28 + $0x28] sm:$0xff] }
 0x818   : > { %2707 = vmatpush.bf16.msrb.mxu2 %v3680_v47 }
 0x81c   : > { %2708 = vmatpush.bf16.msrb.mxu2 %v3679_v43 }
 0x820   : > { %2709 = vmatpush.bf16.msrb.mxu2 %v3678_v51 }
 0x83e   : > { %v1992_v11 = vpop.xlane.xlu0 %1991 }
 0x83f   : > { %v1995_v16 = vmul.f32 %v1992_v11, %v4281_v32  ;;  %v3656_v11 = vld [vmem:[%s4224_s3 + $0x74] sm:$0xf0] }
 0x841   : > { %v4607_v17 = vsub.f32 %v4590_v63, %v1995_v16  ;;  %v3362_v16 = vor.u32 %v3653_v35, %v3359_v2 }
 0x843   : > { %v2001_v19 = vmul.f32 %v4607_v17, %v4607_v17  ;;  %2285 = vmatpush.bf16.msra.mxu3 %v3362_v16 }
 0x845   : > { %2006 = vadd.xlane.f32.xlu2 %v2001_v19  ;;  %v3366_v19 = vor.u32 %v3656_v11, %v3365_v10 }
 0x847   : > { %2303 = vmatpush.bf16.msra.mxu0 %v3366_v19  ;;  %2286 = vmatpush.bf16.msra.mxu3 %v3346_v30 }
 0x84b   : > { %2304 = vmatpush.bf16.msra.mxu0 %v3350_v42  ;;  %2287 = vmatpush.bf16.msra.mxu3 %v3330_v13  ;;  %v3704_v13 = vld [vmem:[%s4234_s28 + $0xf8] sm:$0xff] }
 0x84c   : > { %2761 = vmatpush.bf16.msrb.mxu1 %v3704_v13 }
 0x84f   : > { %2305 = vmatpush.bf16.msra.mxu0 %v3334_v45  ;;  %2288 = vmatpush.bf16.msra.mxu3 %v3314_v52  ;;  %v3695_v45 = vld [vmem:[%s4234_s28 + $0xb0] sm:$0xff]  ;;  %v3686_v52 = vld [vmem:[%s4234_s28 + $0x68] sm:$0xff] }
 0x853   : > { %2306 = vmatpush.bf16.msra.mxu0 %v3318_v54  ;;  %2725 = vmatpush.bf16.msrb.mxu3 %v3688_v48  ;;  %v3677_v54 = vld [vmem:[%s4234_s28 + $0x20] sm:$0xff] }
 0x854   : > { %2710 = vmatpush.bf16.msrb.mxu2 %v3677_v54 }
 0x857   : > { %2726 = vmatpush.bf16.msrb.mxu3 %v3687_v59 }
 0x85b   : > { %2727 = vmatpush.bf16.msrb.mxu3 %v3686_v52 }
 0x85f   : > { %2728 = vmatpush.bf16.msrb.mxu3 %v3685_v58 }
 0x877   : > { %v2003_v38 = vpop.xlane.xlu2 %2002 }
 0x878   : > { %v2008_v44 = vmul.f32 %v2003_v38, %v4281_v32 }
 0x87a   : > { %v2011_v36 = vadd.f32 1e-05, %v2008_v44  ;;  %v3696_v44 = vld [vmem:[%s4234_s28 + $0xb8] sm:$0xff] }
 0x87b   : > { %2743 = vmatpush.bf16.msrb.mxu0 %v3696_v44 }
 0x87c   : > { %3864 = vrsqrt.f32 %v2011_v36  ;;  %vm2020_vm13 = vweird.f32 %v2011_v36 }
 0x87f   : > { %v2005_v61 = vpop.xlane.xlu0 %2004  ;;  %2744 = vmatpush.bf16.msrb.mxu0 %v3695_v45 }
 0x880   : > { %v2009_v0 = vmul.f32 %v2005_v61, %v4281_v32  ;;  %v2093_v61 = vld [vmem:[%s4229_s19] sm:$0xf] }
 0x882   : > { %v3865_v21 = vpop.eup %3864  ;;  %v2012_v62 = vadd.f32 1e-05, %v2009_v0  ;;  %v3676_v0 = vld [vmem:[%s4234_s28 + $0x18] sm:$0xff] }
 0x883   : > { %v2015_v55 = vmul.f32 %v3865_v21, %v2011_v36  ;;  %vm2021_vm10 = vweird.f32 %v3865_v21  ;;  %2745 = vmatpush.bf16.msrb.mxu0 %v3694_v49  ;;  %v3701_v36 = vld [vmem:[%s4234_s28 + $0xe0] sm:$0xff]  ;;  %2711 = vmatpush.bf16.msrb.mxu2 %v3676_v0 }
 0x884   : > { %3866 = vrsqrt.f32 %v2012_v62  ;;  %vm2022_vm6 = vmor %vm2020_vm13, %vm2021_vm10  ;;  %vm2030_vm8 = vweird.f32 %v2012_v62 }
 0x885   : > { %v2016_v1 = vmul.f32 %v3865_v21, %v2015_v55  ;;  %v3698_v55 = vld [vmem:[%s4234_s28 + $0xc8] sm:$0xff] }
 0x887   : > { %v2017_v3 = vmul.f32 0.5, %v2016_v1  ;;  %2746 = vmatpush.bf16.msrb.mxu0 %v3693_v12  ;;  %v4716_v1 = vperm.slane %v2093_v61, 2 }
 0x889   : > { %v2018_v4 = vsub.f32 1.5, %v2017_v3  ;;  %v4718_v3 = vperm.slane %v2093_v61, 3 }
 0x88a   : > { %v3867_v35 = vpop.eup %3866 }
 0x88b   : > { %v2019_v7 = vmul.f32 %v3865_v21, %v2018_v4  ;;  %v2025_v2 = vmul.f32 %v3867_v35, %v2012_v62  ;;  %vm2031_vm7 = vweird.f32 %v3867_v35  ;;  %2747 = vmatpush.bf16.msrb.mxu0 %v3692_v14  ;;  %v3690_v62 = vld [vmem:[%s4234_s28 + $0x88] sm:$0xff]  ;;  %v3675_v4 = vld [vmem:[%s4234_s28 + $0x10] sm:$0xff] }
 0x88c   : > { %vm2032_vm9 = vmor %vm2030_vm8, %vm2031_vm7  ;;  %2712 = vmatpush.bf16.msrb.mxu2 %v3675_v4 }
 0x88d   : > { %v2026_v10 = vmul.f32 %v3867_v35, %v2025_v2  ;;  %v2023_v11 = vsel %vm2022_vm6, %v3865_v21, %v2019_v7  ;;  %v3684_v21 = vld [vmem:[%s4234_s28 + $0x58] sm:$0xff] }
 0x88e   : > { %v2044_v20 = vmul.f32 %v2023_v11, %v4595_v6  ;;  %2729 = vmatpush.bf16.msrb.mxu3 %v3684_v21  ;;  %v3697_v11 = vld [vmem:[%s4234_s28 + $0xc0] sm:$0xff] }
 0x88f   : > { %v2027_v16 = vmul.f32 0.5, %v2026_v10  ;;  %2748 = vmatpush.bf16.msrb.mxu0 %v3691_v60  ;;  %v3689_v10 = vld [vmem:[%s4234_s28 + $0x80] sm:$0xff] }
 0x890   : > { %v2050_v26 = vmul.f32 %v3805_v5, %v2044_v20  ;;  %v4730_v20 = vperm.slane %v2093_v61, 0 }
 0x891   : > { %v2028_v19 = vsub.f32 1.5, %v2027_v16 }
 0x892   : > { %v2056_v29 = vadd.f32 %v3806_v27, %v2050_v26 }
 0x893   : > { %v2029_v22 = vmul.f32 %v3867_v35, %v2028_v19  ;;  %2749 = vmatpush.bf16.msrb.mxu0 %v3690_v62 }
 0x895   : > { %v2033_v23 = vsel %vm2032_vm9, %v3867_v35, %v2029_v22  ;;  %v3683_v35 = vld [vmem:[%s4234_s28 + $0x50] sm:$0xff]  ;;  %v3674_v22 = vld [vmem:[%s4234_s28 + $0x8] sm:$0xff] }
 0x896   : > { %v2045_v25 = vmul.f32 %v2033_v23, %v4601_v8  ;;  %2730 = vmatpush.bf16.msrb.mxu3 %v3683_v35  ;;  %v3682_v23 = vld [vmem:[%s4234_s28 + $0x48] sm:$0xff]  ;;  %2713 = vmatpush.bf16.msrb.mxu2 %v3674_v22 }
 0x897   : > { %2750 = vmatpush.bf16.msrb.mxu0 %v3689_v10 }
 0x898   : > { %v2051_v28 = vmul.f32 %v3805_v5, %v2045_v25 }
 0x89a   : > { %v2057_v6 = vadd.f32 %v3806_v27, %v2051_v28  ;;  %2731 = vmatpush.bf16.msrb.mxu3 %v3682_v23 }
 0x89c   : > { %v2059_v24 = vpack.c.bf16 %v2057_v6, %v2056_v29 }
 0x89e   : > { %2271 = vmatmul.bf16.vlgmr.msra.gmra.mxu2 %v2059_v24  ;;  %2289 = vmatmul.bf16.vlgmr.msra.gmra.mxu3 %v2059_v24 }
 0x89f   : > { %2307 = vmatmul.bf16.vlgmr.msra.gmra.mxu0 %v2059_v24  ;;  %2325 = vmatmul.bf16.vlgmr.msra.gmra.mxu1 %v2059_v24 }
 0x8b8   : > { %v2007_v30 = vpop.xlane.xlu2 %2006 }
 0x8b9   : > { %v2010_v42 = vmul.f32 %v2007_v30, %v4281_v32 }
 0x8bb   : > { %v2013_v40 = vadd.f32 1e-05, %v2010_v42  ;;  %v3673_v42 = vld [vmem:[%s4234_s28] sm:$0xff] }
 0x8bc   : > { %2714 = vmatpush.bf16.msrb.mxu2 %v3673_v42 }
 0x8bd   : > { %3868 = vrsqrt.f32 %v2013_v40  ;;  %vm2040_vm14 = vweird.f32 %v2013_v40 }
 0x8c3   : > { %v3869_v8 = vpop.eup %3868 }
 0x8c4   : > { %v2035_v31 = vmul.f32 %v3869_v8, %v2013_v40  ;;  %vm2041_vm12 = vweird.f32 %v3869_v8  ;;  %v3681_v40 = vld [vmem:[%s4234_s28 + $0x40] sm:$0xff] }
 0x8c5   : > { %vm2042_vm11 = vmor %vm2040_vm14, %vm2041_vm12  ;;  %2732 = vmatpush.bf16.msrb.mxu3 %v3681_v40 }
 0x8c6   : > { %v2036_v33 = vmul.f32 %v3869_v8, %v2035_v31 }
 0x8c8   : > { %v2037_v34 = vmul.f32 0.5, %v2036_v33 }
 0x8ca   : > { %v2038_v18 = vsub.f32 1.5, %v2037_v34 }
 0x8cc   : > { %v2039_v37 = vmul.f32 %v3869_v8, %v2038_v18 }
 0x8ce   : > { %v2043_v38 = vsel %vm2042_vm11, %v3869_v8, %v2039_v37 }
 0x8cf   : > { %v2046_v39 = vmul.f32 %v2043_v38, %v4607_v17  ;;  %v3703_v17 = vld [vmem:[%s4234_s28 + $0xf0] sm:$0xff] }
 0x8d0   : > { %2762 = vmatpush.bf16.msrb.mxu1 %v3703_v17 }
 0x8d1   : > { %v2052_v15 = vmul.f32 %v3805_v5, %v2046_v39  ;;  %v4732_v5 = vperm.slane %v2093_v61, 1 }
 0x8d3   : > { %v2058_v9 = vadd.f32 %v3806_v27, %v2052_v15 }
 0x8d4   : > { %2763 = vmatpush.bf16.msrb.mxu1 %v3702_v46 }
 0x8d5   : > { %v2060_v41 = vpack.c.bf16 %v2058_v9, %v2058_v9 }
 0x8d7   : > { %2276 = vmatmul.bf16.gmra.mxu2 %v2060_v41  ;;  %2294 = vmatmul.bf16.gmra.mxu3 %v2060_v41 }
 0x8d8   : > { %2312 = vmatmul.bf16.gmra.mxu0 %v2060_v41  ;;  %2330 = vmatmul.bf16.gmra.mxu1 %v2060_v41 }
 0x8d9   : > { %2764 = vmatpush.bf16.msrb.mxu1 %v3701_v36 }
 0x8dd   : > { %2765 = vmatpush.bf16.msrb.mxu1 %v3700_v53 }
 0x8e1   : > { %2766 = vmatpush.bf16.msrb.mxu1 %v3699_v56 }
 0x8e5   : > { %2767 = vmatpush.bf16.msrb.mxu1 %v3698_v55 }
 0x8e9   : > { %2768 = vmatpush.bf16.msrb.mxu1 %v3697_v11 }
 0x91c   : > { %v2308_v7 = vpop.f32.mrf.mxu0  ;;  %v2326_v2 = vpop.f32.mrf.mxu1 }
 0x91d   : > { %v4725_v16 = vadd.f32 %v2308_v7, %v4716_v1  ;;  %v4728_v19 = vadd.f32 %v2326_v2, %v4718_v3 }
 0x91f   : > { %v2337_v25 = vmul.f32 %v4725_v16, %v4725_v16  ;;  %v2338_v26 = vmul.f32 %v4728_v19, %v4728_v19 }
 0x921   : > { %v2349_v27 = vmul.f32 %v2337_v25, %v4725_v16  ;;  %v2350_v28 = vmul.f32 %v2338_v26, %v4728_v19  ;;  %v2272_v29 = vpop.f32.mrf.mxu2  ;;  %v2290_v6 = vpop.f32.mrf.mxu3 }
 0x922   : > { %v4743_v24 = vadd.f32 %v2272_v29, %v4730_v20  ;;  %v4746_v30 = vadd.f32 %v2290_v6, %v4732_v5 }
 0x923   : > { %v2361_v8 = vmul.f32 0.044715, %v2349_v27  ;;  %v2362_v31 = vmul.f32 0.044715, %v2350_v28 }
 0x924   : > { %v2335_v33 = vmul.f32 %v4743_v24, %v4743_v24  ;;  %v2336_v34 = vmul.f32 %v4746_v30, %v4746_v30  ;;  %v2310_v18 = vpop.f32.mrf.mxu0  ;;  %v2328_v37 = vpop.f32.mrf.mxu1 }
 0x925   : > { %v2373_v38 = vadd.f32 %v2361_v8, %v4725_v16  ;;  %v2374_v39 = vadd.f32 %v2362_v31, %v4728_v19  ;;  %v2311_v15 = vadd.f32 %v2310_v18, %v4716_v1  ;;  %v4758_v9 = vadd.f32 %v2328_v37, %v4718_v3 }
 0x926   : > { %v2347_v41 = vmul.f32 %v2335_v33, %v4743_v24  ;;  %v2348_v44 = vmul.f32 %v2336_v34, %v4746_v30 }
 0x927   : > { %v2385_v13 = vmul.f32 0.7978846, %v2373_v38  ;;  %v2341_v45 = vmul.f32 %v2311_v15, %v2311_v15  ;;  %v2342_v17 = vmul.f32 %v4758_v9, %v4758_v9  ;;  %v2386_v47 = vmul.f32 0.7978846, %v2374_v39 }
 0x928   : > { %v2359_v48 = vmul.f32 0.044715, %v2347_v41  ;;  %v2360_v49 = vmul.f32 0.044715, %v2348_v44 }
 0x929   : > { %v2353_v46 = vmul.f32 %v2341_v45, %v2311_v15  ;;  %v2354_v43 = vmul.f32 %v2342_v17, %v4758_v9  ;;  %v2274_v59 = vpop.f32.mrf.mxu2  ;;  %v2292_v12 = vpop.f32.mrf.mxu3  ;;  %3870 = vtanh.f32 %v2385_v13 }
 0x92a   : > { %v2371_v36 = vadd.f32 %v2359_v48, %v4743_v24  ;;  %v2372_v51 = vadd.f32 %v2360_v49, %v4746_v30  ;;  %v2275_v52 = vadd.f32 %v2274_v59, %v4730_v20  ;;  %v2293_v54 = vadd.f32 %v2292_v12, %v4732_v5 }
 0x92b   : > { %v2365_v14 = vmul.f32 0.044715, %v2353_v46  ;;  %v2366_v53 = vmul.f32 0.044715, %v2354_v43  ;;  %3872 = vtanh.f32 %v2386_v47 }
 0x92c   : > { %v2383_v58 = vmul.f32 0.7978846, %v2371_v36  ;;  %v2384_v60 = vmul.f32 0.7978846, %v2372_v51  ;;  %v2339_v56 = vmul.f32 %v2275_v52, %v2275_v52  ;;  %v2340_v21 = vmul.f32 %v2293_v54, %v2293_v54 }
 0x92d   : > { %v2377_v61 = vadd.f32 %v2365_v14, %v2311_v15  ;;  %v2378_v0 = vadd.f32 %v2366_v53, %v4758_v9 }
 0x92e   : > { %v2351_v62 = vmul.f32 %v2339_v56, %v2275_v52  ;;  %3874 = vtanh.f32 %v2383_v58  ;;  %v2352_v35 = vmul.f32 %v2340_v21, %v2293_v54 }
 0x92f   : > { %v2389_v55 = vmul.f32 0.7978846, %v2377_v61  ;;  %v2390_v4 = vmul.f32 0.7978846, %v2378_v0  ;;  %3876 = vtanh.f32 %v2384_v60  ;;  %v3871_v2 = vpop.eup %3870 }
 0x930   : > { %v2363_v7 = vmul.f32 0.044715, %v2351_v62  ;;  %v2364_v10 = vmul.f32 0.044715, %v2352_v35  ;;  %v2409_v25 = vadd.f32 1.0, %v3871_v2 }
 0x931   : > { %3878 = vtanh.f32 %v2389_v55  ;;  %v3873_v11 = vpop.eup %3872 }
 0x932   : > { %3880 = vtanh.f32 %v2390_v4  ;;  %v2375_v22 = vadd.f32 %v2363_v7, %v2275_v52  ;;  %v2376_v23 = vadd.f32 %v2364_v10, %v2293_v54  ;;  %v2410_v28 = vadd.f32 1.0, %v3873_v11 }
 0x933   : > { %v2421_v8 = vmul.f32 0.5, %v2409_v25 }
 0x934   : > { %v2387_v26 = vmul.f32 0.7978846, %v2375_v22  ;;  %v3875_v27 = vpop.eup %3874  ;;  %v2388_v29 = vmul.f32 0.7978846, %v2376_v23  ;;  %v2422_v33 = vmul.f32 0.5, %v2410_v28 }
 0x935   : > { %v3877_v6 = vpop.eup %3876  ;;  %v2407_v34 = vadd.f32 1.0, %v3875_v27  ;;  %v2433_v44 = vmul.f32 %v2421_v8, %v4725_v16 }
 0x936   : > { %3882 = vtanh.f32 %v2387_v26  ;;  %v2408_v37 = vadd.f32 1.0, %v3877_v6  ;;  %v2434_v17 = vmul.f32 %v2422_v33, %v4728_v19 }
 0x937   : > { %v3879_v42 = vpop.eup %3878  ;;  %3884 = vtanh.f32 %v2388_v29  ;;  %v2419_v47 = vmul.f32 0.5, %v2407_v34 }
 0x938   : > { %v3881_v40 = vpop.eup %3880  ;;  %v2413_v31 = vadd.f32 1.0, %v3879_v42  ;;  %v2420_v46 = vmul.f32 0.5, %v2408_v37 }
 0x939   : > { %v2414_v18 = vadd.f32 1.0, %v3881_v40  ;;  %v2431_v14 = vmul.f32 %v2419_v47, %v4743_v24 }
 0x93a   : > { %v2425_v38 = vmul.f32 0.5, %v2413_v31  ;;  %v2432_v16 = vmul.f32 %v2420_v46, %v4746_v30 }
 0x93b   : > { %v2426_v39 = vmul.f32 0.5, %v2414_v18 }
 0x93c   : > { %v3883_v41 = vpop.eup %3882  ;;  %v2437_v13 = vmul.f32 %v2425_v38, %v2311_v15 }
 0x93d   : > { %v3885_v45 = vpop.eup %3884  ;;  %v2438_v48 = vmul.f32 %v2426_v39, %v4758_v9  ;;  %v2411_v49 = vadd.f32 1.0, %v3883_v41 }
 0x93e   : > { %v2412_v43 = vadd.f32 1.0, %v3885_v45  ;;  %v2445_v59 = vpack.c.bf16 %v2437_v13, %v2433_v44 }
 0x93f   : > { %v2423_v12 = vmul.f32 0.5, %v2411_v49  ;;  %v2446_v36 = vpack.c.bf16 %v2438_v48, %v2434_v17 }
 0x940   : > { %v2424_v51 = vmul.f32 0.5, %v2412_v43  ;;  %2751 = vmatmul.bf16.vlgmr.msrb.gmra.mxu0 %v2445_v59 }
 0x941   : > { %v2435_v53 = vmul.f32 %v2423_v12, %v2275_v52  ;;  %2769 = vmatmul.bf16.vlgmr.msrb.gmra.mxu1 %v2446_v36 }
 0x942   : > { %v2436_v15 = vmul.f32 %v2424_v51, %v2293_v54 }
 0x943   : > { %v2443_v58 = vpack.c.bf16 %v2435_v53, %v2431_v14 }
 0x944   : > { %v2444_v19 = vpack.c.bf16 %v2436_v15, %v2432_v16 }
 0x945   : > { %2715 = vmatmul.bf16.vlgmr.msrb.gmra.mxu2 %v2443_v58 }
 0x946   : > { %2733 = vmatmul.bf16.vlgmr.msrb.gmra.mxu3 %v2444_v19  ;;  %v3807_v19 = vld [vmem:[%s809_s22] ss:$0 sm:$0xff] }
 0x955   : > { %v2313_v9 = vpop.f32.mrf.mxu0  ;;  %v2331_v60 = vpop.f32.mrf.mxu1 }
 0x956   : > { %v2314_v56 = vadd.f32 %v2313_v9, %v4716_v1  ;;  %v2332_v61 = vadd.f32 %v2331_v60, %v4718_v3 }
 0x958   : > { %v2345_v0 = vmul.f32 %v2314_v56, %v2314_v56  ;;  %v2346_v21 = vmul.f32 %v2332_v61, %v2332_v61 }
 0x95a   : > { %v2357_v62 = vmul.f32 %v2345_v0, %v2314_v56  ;;  %v2358_v55 = vmul.f32 %v2346_v21, %v2332_v61  ;;  %v2277_v24 = vpop.f32.mrf.mxu2  ;;  %v2295_v52 = vpop.f32.mrf.mxu3 }
 0x95b   : > { %v2278_v4 = vadd.f32 %v2277_v24, %v4730_v20  ;;  %v2296_v30 = vadd.f32 %v2295_v52, %v4732_v5 }
 0x95c   : > { %v2369_v54 = vmul.f32 0.044715, %v2357_v62  ;;  %v2370_v35 = vmul.f32 0.044715, %v2358_v55 }
 0x95d   : > { %v2343_v7 = vmul.f32 %v2278_v4, %v2278_v4  ;;  %v2344_v2 = vmul.f32 %v2296_v30, %v2296_v30  ;;  %v2315_v10 = vpop.f32.mrf.mxu0  ;;  %v2333_v11 = vpop.f32.mrf.mxu1 }
 0x95e   : > { %v2381_v22 = vadd.f32 %v2369_v54, %v2314_v56  ;;  %v2382_v1 = vadd.f32 %v2370_v35, %v2332_v61 }
 0x95f   : > { %v2355_v23 = vmul.f32 %v2343_v7, %v2278_v4  ;;  %v2356_v3 = vmul.f32 %v2344_v2, %v2296_v30 }
 0x960   : > { %v2393_v25 = vmul.f32 0.7978846, %v2381_v22  ;;  %v2394_v26 = vmul.f32 0.7978846, %v2382_v1 }
 0x961   : > { %v2367_v27 = vmul.f32 0.044715, %v2355_v23  ;;  %v2368_v28 = vmul.f32 0.044715, %v2356_v3 }
 0x962   : > { %v2279_v29 = vpop.f32.mrf.mxu2  ;;  %v2297_v6 = vpop.f32.mrf.mxu3  ;;  %3886 = vtanh.f32 %v2393_v25 }
 0x963   : > { %3888 = vtanh.f32 %v2394_v26  ;;  %v2379_v20 = vadd.f32 %v2367_v27, %v2278_v4  ;;  %v2380_v5 = vadd.f32 %v2368_v28, %v2296_v30 }
 0x965   : > { %v2391_v42 = vmul.f32 0.7978846, %v2379_v20  ;;  %v2392_v40 = vmul.f32 0.7978846, %v2380_v5 }
 0x967   : > { %3890 = vtanh.f32 %v2391_v42 }
 0x968   : > { %v3887_v8 = vpop.eup %3886  ;;  %3892 = vtanh.f32 %v2392_v40 }
 0x969   : > { %v3889_v31 = vpop.eup %3888  ;;  %v2417_v33 = vadd.f32 1.0, %v3887_v8 }
 0x96a   : > { %v2418_v34 = vadd.f32 1.0, %v3889_v31 }
 0x96b   : > { %v2429_v18 = vmul.f32 0.5, %v2417_v33 }
 0x96c   : > { %v2430_v37 = vmul.f32 0.5, %v2418_v34 }
 0x96d   : > { %v3891_v38 = vpop.eup %3890  ;;  %v2441_v39 = vmul.f32 %v2429_v18, %v2314_v56 }
 0x96e   : > { %v3893_v41 = vpop.eup %3892  ;;  %v2442_v44 = vmul.f32 %v2430_v37, %v2332_v61  ;;  %v2415_v13 = vadd.f32 1.0, %v3891_v38 }
 0x96f   : > { %v2449_v45 = vpack.c.bf16 %v2441_v39, %v2441_v39  ;;  %v2416_v17 = vadd.f32 1.0, %v3893_v41 }
 0x970   : > { %v2450_v47 = vpack.c.bf16 %v2442_v44, %v2442_v44  ;;  %v2427_v48 = vmul.f32 0.5, %v2415_v13 }
 0x971   : > { %2756 = vmatmul.bf16.gmra.mxu0 %v2449_v45  ;;  %v2428_v49 = vmul.f32 0.5, %v2416_v17 }
 0x972   : > { %2774 = vmatmul.bf16.gmra.mxu1 %v2450_v47  ;;  %v2439_v46 = vmul.f32 %v2427_v48, %v2278_v4 }
 0x973   : > { %v2440_v43 = vmul.f32 %v2428_v49, %v2296_v30 }
 0x974   : > { %v2447_v59 = vpack.c.bf16 %v2439_v46, %v2439_v46 }
 0x975   : > { %v2448_v12 = vpack.c.bf16 %v2440_v43, %v2440_v43 }
 0x976   : > { %2720 = vmatmul.bf16.gmra.mxu2 %v2447_v59 }
 0x977   : > { %2738 = vmatmul.bf16.gmra.mxu3 %v2448_v12 }
 0x9bd   : > { %v2752_v51 = vpop.f32.mrf.mxu0 }
 0x9be   : > { %v2770_v16 = vpop.f32.mrf.mxu1 }
 0x9c5   : > { %v2754_v21 = vpop.f32.mrf.mxu0 }
 0x9c6   : > { %v2772_v55 = vpop.f32.mrf.mxu1 }
 0x9c8   : > { %v2716_v36 = vpop.f32.mrf.mxu2 }
 0x9c9   : > { %v2734_v14 = vpop.f32.mrf.mxu3 }
 0x9ca   : > { %v2735_v53 = vadd.f32 %v2734_v14, %v2716_v36 }
 0x9cc   : > { %v2753_v15 = vadd.f32 %v2752_v51, %v2735_v53 }
 0x9ce   : > { %v2771_v58 = vadd.f32 %v2770_v16, %v2753_v15 }
 0x9d0   : > { %v2779_v9 = vadd.f32 %v2771_v58, %v4583_v50  ;;  %v2718_v60 = vpop.f32.mrf.mxu2 }
 0x9d1   : > { %v2736_v56 = vpop.f32.mrf.mxu3 }
 0x9d2   : > { %v2786_v61 = vadd.f32 %v3807_v19, %v2779_v9  ;;  %v2737_v0 = vadd.f32 %v2736_v56, %v2718_v60 }
 0x9d4   : > { %2789 = vst [vmem:[#allocation2 + $0x10] sm:$0xff] %v2786_v61  ;;  %v2755_v62 = vadd.f32 %v2754_v21, %v2737_v0 }
 0x9d6   : > { %v2773_v24 = vadd.f32 %v2772_v55, %v2755_v62 }
 0x9d8   : > { %v2780_v52 = vadd.f32 %v2773_v24, %v4586_v57 }
 0x9da   : > { %v2787_v4 = vadd.f32 %v3807_v19, %v2780_v52 }
 0x9dc   : > { %2790 = vst [vmem:[#allocation2] sm:$0xff] %v2787_v4 }
 0x9ee   : > { %v2757_v30 = vpop.f32.mrf.mxu0 }
 0x9ef   : > { %v2775_v54 = vpop.f32.mrf.mxu1 }
 0x9f6   : > { %v2759_v35 = vpop.f32.mrf.mxu0 }
 0x9f7   : > { %v2777_v7 = vpop.f32.mrf.mxu1 }
 0x9f9   : > { %v2721_v2 = vpop.f32.mrf.mxu2 }
 0x9fa   : > { %v2739_v10 = vpop.f32.mrf.mxu3 }
 0x9fb   : > { %v2740_v50 = vadd.f32 %v2739_v10, %v2721_v2 }
 0x9fd   : > { %v2758_v11 = vadd.f32 %v2757_v30, %v2740_v50 }
 0x9ff   : > { %v2776_v22 = vadd.f32 %v2775_v54, %v2758_v11 }
 0xa01   : > { %v2781_v1 = vadd.f32 %v2776_v22, %v4590_v63  ;;  %v2723_v23 = vpop.f32.mrf.mxu2  ;;  %2795 = sbr.rel (%p3563_p1) target bundleno = 2971 (0xb9b), region = 104 }
 0xa02   : > { %v2741_v3 = vpop.f32.mrf.mxu3 }
 0xa03   : > { %v2788_v25 = vadd.f32 %v3807_v19, %v2781_v1 }
 0xa05   : > { %2791 = vst [vmem:[#allocation2 + $0x8] sm:$0xff] %v2788_v25 }
 0xa06   : > { %vm2798_vm15 = vcmask 1040384   ;;  %v3712_v26 = vld [vmem:[%s4949_s2 + $0x38] sm:$0xff]  ;;  %v3711_v20 = vld [vmem:[%s4950_s24 + $0x30] sm:$0xff]  ;;  %v3710_v5 = vld [vmem:[%s4950_s24 + $0x28] sm:$0xff] }
 0xa07   : > { %v2799_v57 = vsel %vm2798_vm15, %v2786_v61, 0.0  ;;  %2889 = vmatpush.bf16.msra.mxu0 %v3712_v26  ;;  %v3709_v42 = vld [vmem:[%s4950_s24 + $0x20] sm:$0xff]  ;;  %v3708_v40 = vld [vmem:[%s4950_s24 + $0x18] sm:$0xff]  ;;  %v3707_v8 = vld [vmem:[%s4950_s24 + $0x10] sm:$0xff] }
 0xa08   : > { %2800 = vadd.xlane.f32.xlu0 %v2799_v57  ;;  %v3706_v31 = vld [vmem:[%s4950_s24 + $0x8] sm:$0xff]  ;;  %v3705_v33 = vld [vmem:[%s4950_s24] sm:$0xff] }
 0xa09   : > { %v2796_v17 = vld [vmem:[%s4951_s29] sm:$0x1] }
 0xa0a   : > { %v2840_v59 = vld [vmem:[%s4953_s25] sm:$0x1] }
 0xa0b   : > { %2890 = vmatpush.bf16.msra.mxu0 %v3711_v20 }
 0xa0f   : > { %2891 = vmatpush.bf16.msra.mxu0 %v3710_v5 }
 0xa13   : > { %2892 = vmatpush.bf16.msra.mxu0 %v3709_v42 }
 0xa17   : > { %2893 = vmatpush.bf16.msra.mxu0 %v3708_v40 }
 0xa1b   : > { %2894 = vmatpush.bf16.msra.mxu0 %v3707_v8 }
 0xa1f   : > { %2895 = vmatpush.bf16.msra.mxu0 %v3706_v31 }
 0xa23   : > { %2896 = vmatpush.bf16.msra.mxu0 %v3705_v33 }
 0xa7b   : > { %v2801_v27 = vpop.xlane.xlu0 %2800 }
 0xa7c   : > { %v2802_v28 = vmul.f32 %v2801_v27, %v4281_v32 }
 0xa7e   : > { %v2803_v29 = vsub.f32 %v2786_v61, %v2802_v28 }
 0xa80   : > { %v2804_v63 = vmul.f32 %v2803_v29, %v2803_v29 }
 0xa82   : > { %v2805_v6 = vsel %vm2798_vm15, %v2804_v63, 0.0 }
 0xa83   : > { %2806 = vadd.xlane.f32.xlu0 %v2805_v6 }
 0xaf6   : > { %v2807_v34 = vpop.xlane.xlu0 %2806 }
 0xaf7   : > { %v2808_v18 = vmul.f32 %v2807_v34, %v4281_v32  ;;  %v2797_v32 = vld [vmem:[%s4952_s5] sm:$0x1] }
 0xaf9   : > { %v2809_v37 = vadd.f32 1e-05, %v2808_v18 }
 0xafb   : > { %3897 = vrsqrt.f32 %v2809_v37  ;;  %vm2816_vm1 = vweird.f32 %v2809_v37 }
 0xb01   : > { %v3898_v38 = vpop.eup %3897 }
 0xb02   : > { %v2811_v39 = vmul.f32 %v3898_v38, %v2809_v37  ;;  %vm2817_vm0 = vweird.f32 %v3898_v38 }
 0xb03   : > { %vm2818_vm2 = vmor %vm2816_vm1, %vm2817_vm0 }
 0xb04   : > { %v2812_v41 = vmul.f32 %v3898_v38, %v2811_v39 }
 0xb06   : > { %v2813_v44 = vmul.f32 0.5, %v2812_v41 }
 0xb08   : > { %v2814_v13 = vsub.f32 1.5, %v2813_v44 }
 0xb0a   : > { %v2815_v45 = vmul.f32 %v3898_v38, %v2814_v13 }
 0xb0c   : > { %v2819_v47 = vsel %vm2818_vm2, %v3898_v38, %v2815_v45 }
 0xb0d   : > { %v2820_v48 = vmul.f32 %v2819_v47, %v2803_v29 }
 0xb0f   : > { %v2821_v49 = vmul.f32 %v2820_v48, %v2796_v17 }
 0xb11   : > { %v2822_v46 = vadd.f32 %v2821_v49, %v2797_v32 }
 0xb13   : > { %v2823_v43 = vpack.c.bf16 %v2822_v46, %v2822_v46 }
 0xb15   : > { %2897 = vmatmul.bf16.vlgmr.msra.gmra.mxu0 %v2823_v43 }
 0xb92   : > { %v2898_v12 = vpop.f32.mrf.mxu0 }
 0xb93   : > { %v2899_v36 = vadd.f32 %v2898_v12, %v2840_v59 }
 0xb95   : > { %2902 = vst [vmem:[%s4242_s17] sm:$0x1] %v2899_v36 }
 0xb9a   : > { %v2900_v51 = vpop.f32.mrf.mxu0 }
 0xb9b PF: > { %s4954_s1 = sld [smem:[#allocation9_spill]]  ;;  %s2914_s19 = sshll.u32 %s4242_s17, 4  ;;  %s2915_s19 = int_to_ptr.vmem [resolvable:$true] %s2914_s19 }
 0xb9c   : > { %s4955_s21 = sld [smem:[#allocation29_spill]]  ;;  %s4958_s0 = sand.u32 1, %s3969_s30  }
 0xb9d   : > { %s2904_s22 = scalar_lea.sflag [#allocation4], %s4958_s0 }
 0xba2   : > { %s4956_s7 = smov %s4955_s21  ;;  %s2912_s15 = scalar_lea.hbm %s4955_s21, %s4954_s1 }
 0xba3   : > { %s2916_s28 = sshll.u32 %s2912_s15, 4  ;;  %s3919_s6 = scalar_lea.hbm %s4956_s7, 2  ;;  %s2917_s28 = int_to_ptr.hbm [resolvable:$true] %s2916_s28 }
 0xba4   : > { %s3913_s29 = sshra.s32 %s2917_s28, 4  ;;  %s3914_s29 = int_to_ptr.hbm [resolvable:$true] %s3913_s29 }
 0xba5   : > { %s3915_s2 = scalar_lea.hbm %s3914_s29, 1  ;;  %p3920_p6 = scmp.lt.s32.totalorder %s3914_s29, %s4956_s7 }
 0xba6   : > { %p3916_p2 = scmp.ne.s32.totalorder %s3914_s29, %s3915_s2  ;;  %p3921_p7 = scmp.lt.s32.totalorder %s3919_s6, %s3915_s2 }
 0xba8   : > { %p3917_p4 = pnand %p3916_p2, %p4149_p3  ;;  %p3922_p8 = por %p3921_p7, %p3920_p6 }
 0xbaa   : > { %p3918_p5 = pneg %p3917_p4 }
 0xbac   : > { %p3923_p10 = pnand %p3922_p8, %p3918_p5 }
 0xbae   : > { %3926 = shalt.err (!%p3923_p10)
}
 0xbaf   : > { %3726 = dma.vmem_to_hbm [thread:$0]  (%p4149_p3), %s2915_s19, 16, %s2917_s28, %s2904_s22  }
 0xbb0 PF: > { %s4959_s17 = sld [smem:[#allocation12_spill]] }
 0xbb1   : > { %s4960_s1 = sld [smem:[#allocation6_spill]] }
 0xbb6   : > { %p3732_p11 = scmp.ge.s32.totalorder %s4959_s17, 2 }
 0xbb7   : > { %s2928_s18 = sand.u32 1, %s4960_s1  }
 0xbb8   : > { %p3729_p12 = pnand %p3732_p11, %p4159_p9  ;;  %s2929_s21 = scalar_lea.sflag [#allocation4], %s2928_s18 }
 0xbba   : > { %p3730_p13 = pneg %p3729_p12 }
 0xbbc   : > { %3960 = dma.done.wait (%p3730_p13), %s2929_s21, 16  }
 0xbbd   : > { %3962 = vsyncadd (%p3730_p13), %s2929_s21, 4294967280  ;;  %s32_s23 = sadd.s32 1, %s4959_s17   ;;  %s4962_s15 = sld [smem:[#allocation7_spill]] }
 0xbbe   : > { %p29_p0 = scmp.ge.s32.totalorder %s32_s23, 6   ;;  %s4963_s20 = sld [smem:[#allocation17_spill]] }
 0xbbf   : > { %s4964_s21 = sld [smem:[#allocation10_spill]]  ;;  %s4968_s0 = smov %s3969_s30 }
 0xbc0   : > { %s4965_s1 = sld [smem:[#allocation11_spill]]  ;;  %31 = sbr.rel (!%p29_p0) target bundleno = 18 (0x12), region = 175 }
 0xbc1   : > { %s4966_s22 = sld [smem:[#allocation13_spill]] }
 0xbc2   : > { %s4967_s2 = sld [smem:[#allocation15_spill]] }
 0xbc3   : > { %s4969_s30 = smov %s4962_s15 }
 0xbc5   :  { %2934 = vsyncpa [#allocation4], 1 }
 0xbc6   :  { %2936 = vsyncpa [#allocation4 + $0x1], 1 }

</bundles_post_ra>
